<compile_context>
chip_gen: v7x
topology: tpu7x:2x2x1
jax: 0.10.0
libtpu: 0.0.40
codegen_flags: <defaults>
</compile_context>

<pallas_src>
import functools
import math

import jax
import jax.numpy as jnp
from jax.experimental import pallas as pl
from jax.experimental.pallas import tpu as pltpu


# ----------------------------------------------------------------------------
# Fused encoder-stack kernel.  grid = (n_layers,); o_ref is the VMEM-resident
# activation carry (constant output index map across the layer axis).
# ----------------------------------------------------------------------------
def encoder_stack_kernel(x_ref, mask_ref, wattn_ref, wff1_ref, wff2_ref,
                         b1_ref, vecs_ref, o_ref, *, n_heads, batch, seq):
    l = pl.program_id(0)

    # Load the embedded input into the resident carry on layer 0 only.
    @pl.when(l == 0)
    def _():
        o_ref[...] = x_ref[...]

    BS, D = o_ref.shape
    dh = D // n_heads

    x = o_ref[...]                                    # (B*S, D) f32
    x_bf = x.astype(jnp.bfloat16)

    # Per-layer weights (bf16) and packed (D,)-vectors (f32).
    w_all = wattn_ref[0]                              # (4, D, D) bf16
    wq, wk, wv, wo = w_all[0], w_all[1], w_all[2], w_all[3]
    vec = vecs_ref[0]                                 # (9, D) f32
    bq, bk, bv, bo = vec[0:1], vec[1:2], vec[2:3], vec[3:4]
    g1, be1 = vec[4:5], vec[5:6]
    b2 = vec[6:7]
    g2, be2 = vec[7:8], vec[8:9]

    # --- QKV projections for ALL rows at once (bf16 MXU, f32 accumulate).
    # 1/sqrt(dh) is pre-folded into wq/bq at packing time.
    q = jnp.dot(x_bf, wq, preferred_element_type=jnp.float32) + bq
    k = jnp.dot(x_bf, wk, preferred_element_type=jnp.float32) + bk
    v = jnp.dot(x_bf, wv, preferred_element_type=jnp.float32) + bv

    # --- Batched multi-head attention core.  B is a dot_general batch dim; only the
    # small static head loop is unrolled.  Per-head contexts are concatenated on the
    # lane axis and projected with a single K=D matmul against wo.
    q3 = q.reshape(batch, seq, D)                     # major-dim split: free relayout
    k3 = k.reshape(batch, seq, D)
    v3 = v.reshape(batch, seq, D)
    keep = mask_ref[...] > 0.0                        # (B, 1, S), broadcast over queries

    ctx_heads = []
    for h in range(n_heads):                          # static, small
        c0 = h * dh
        q_h = q3[:, :, c0:c0 + dh].astype(jnp.bfloat16)   # (B, S, dh)
        k_h = k3[:, :, c0:c0 + dh].astype(jnp.bfloat16)
        v_h = v3[:, :, c0:c0 + dh].astype(jnp.bfloat16)
        s = jnp.einsum('bqd,bkd->bqk', q_h, k_h,
                       preferred_element_type=jnp.float32)   # (B, S, S)
        s = jnp.where(keep, s, -10000.0)              # == masked_fill(mask==0, -1e4)
        m = jnp.max(s, axis=-1, keepdims=True)
        e = jnp.exp(s - m)
        p = e * pl.reciprocal(jnp.sum(e, axis=-1, keepdims=True), approx=True)
        pv = jnp.einsum('bqk,bkd->bqd', p.astype(jnp.bfloat16), v_h,
                        preferred_element_type=jnp.float32)  # (B, S, dh)
        ctx_heads.append(pv)
    ctx = jnp.concatenate(ctx_heads, axis=-1)         # (B, S, D) head concat
    ctx = ctx.reshape(BS, D)                          # merge leading dims: free
    attn_out = jnp.dot(ctx.astype(jnp.bfloat16), wo,  # single K=D output projection
                       preferred_element_type=jnp.float32) + bo

    # --- Residual + LayerNorm 1 (eps=1e-12, biased variance).
    y = x + attn_out
    mu = jnp.mean(y, axis=-1, keepdims=True)
    var = jnp.mean((y - mu) ** 2, axis=-1, keepdims=True)
    y = (y - mu) * jax.lax.rsqrt(var + 1e-12) * g1 + be1

    # --- Position-wise feed forward (bf16 MXU, f32 accumulate).
    h1 = jnp.dot(y.astype(jnp.bfloat16), wff1_ref[0],
                 preferred_element_type=jnp.float32) + b1_ref[0]
    h1 = jnp.maximum(h1, 0.0)
    f = jnp.dot(h1.astype(jnp.bfloat16), wff2_ref[0],
                preferred_element_type=jnp.float32) + b2

    # --- Residual + LayerNorm 2.
    z = y + f
    mu2 = jnp.mean(z, axis=-1, keepdims=True)
    var2 = jnp.mean((z - mu2) ** 2, axis=-1, keepdims=True)
    z = (z - mu2) * jax.lax.rsqrt(var2 + 1e-12) * g2 + be2

    o_ref[...] = z                                    # carry to next layer + final output


def encoder_stack_pallas(x_flat, src_mask, stacked, n_heads):
    BS, D = x_flat.shape
    B, _, S = src_mask.shape
    n_layers = stacked["w_attn"].shape[0]
    H = stacked["w_ff1"].shape[-1]
    kernel = functools.partial(encoder_stack_kernel,
                               n_heads=n_heads, batch=B, seq=S)

    grid_spec = pltpu.PrefetchScalarGridSpec(
        num_scalar_prefetch=0,
        grid=(n_layers,),
        in_specs=[
            pl.BlockSpec((BS, D), lambda l: (0, 0)),            # x (fetched once)
            pl.BlockSpec((B, 1, S), lambda l: (0, 0, 0)),       # src_mask (1 keep / 0 pad)
            pl.BlockSpec((1, 4, D, D), lambda l: (l, 0, 0, 0)),  # wq/wk/wv/wo (bf16)
            pl.BlockSpec((1, D, H), lambda l: (l, 0, 0)),       # w1 (bf16)
            pl.BlockSpec((1, H, D), lambda l: (l, 0, 0)),       # w2 (bf16)
            pl.BlockSpec((1, 1, H), lambda l: (l, 0, 0)),       # b1
            pl.BlockSpec((1, 9, D), lambda l: (l, 0, 0)),       # packed (D,)-vectors
        ],
        out_specs=pl.BlockSpec((BS, D), lambda l: (0, 0)),      # doubles as layer carry
    )
    return pl.pallas_call(
        kernel,
        out_shape=jax.ShapeDtypeStruct((BS, D), jnp.float32),
        grid_spec=grid_spec,
        compiler_params=pltpu.CompilerParams(
            dimension_semantics=("arbitrary",)),   # layer axis carries state
    )(x_flat, src_mask, stacked["w_attn"], stacked["w_ff1"],
      stacked["w_ff2"], stacked["b1"], stacked["vecs"])


# ----------------------------------------------------------------------------
# Glue (plain JAX): sinusoidal positional encoding + token embedding gather.
# ----------------------------------------------------------------------------
def sinusoidal_pos_encoding(max_len, d_model):
    pos = jnp.arange(max_len, dtype=jnp.float32)[:, None]
    i = jnp.arange(0, d_model, 2, dtype=jnp.float32)
    angle = pos / jnp.power(10000.0, i / d_model)
    pe = jnp.zeros((max_len, d_model), jnp.float32)
    pe = pe.at[:, 0::2].set(jnp.sin(angle))
    pe = pe.at[:, 1::2].set(jnp.cos(angle))
    return pe


def _bf16_round(w):
    # Weights are stored bf16 for the kernel; keep the f32 reference weights
    # bf16-representable so the check isolates kernel error.
    return w.astype(jnp.bfloat16).astype(jnp.float32)


def init_params(key, enc_voc_size, max_len, d_model, ffn_hidden, n_layers):
    keys = jax.random.split(key, 1 + n_layers)
    params = {
        "emb_table": 0.02 * jax.random.normal(
            keys[0], (enc_voc_size, d_model), jnp.float32),
        "pos_enc": sinusoidal_pos_encoding(max_len, d_model),
        "layers": [],
    }
    for l in range(n_layers):
        ks = jax.random.split(keys[1 + l], 8)
        s = 0.02
        layer = {
            "wq": _bf16_round(s * jax.random.normal(ks[0], (d_model, d_model), jnp.float32)),
            "bq": jnp.zeros((1, d_model), jnp.float32),
            "wk": _bf16_round(s * jax.random.normal(ks[1], (d_model, d_model), jnp.float32)),
            "bk": jnp.zeros((1, d_model), jnp.float32),
            "wv": _bf16_round(s * jax.random.normal(ks[2], (d_model, d_model), jnp.float32)),
            "bv": jnp.zeros((1, d_model), jnp.float32),
            "wo": _bf16_round(s * jax.random.normal(ks[3], (d_model, d_model), jnp.float32)),
            "bo": jnp.zeros((1, d_model), jnp.float32),
            "g1": jnp.ones((1, d_model), jnp.float32),
            "be1": jnp.zeros((1, d_model), jnp.float32),
            "w1": _bf16_round(s * jax.random.normal(ks[4], (d_model, ffn_hidden), jnp.float32)),
            "b1": 0.01 * jax.random.normal(ks[5], (1, ffn_hidden), jnp.float32),
            "w2": _bf16_round(s * jax.random.normal(ks[6], (ffn_hidden, d_model), jnp.float32)),
            "b2": 0.01 * jax.random.normal(ks[7], (1, d_model), jnp.float32),
            "g2": jnp.ones((1, d_model), jnp.float32),
            "be2": jnp.zeros((1, d_model), jnp.float32),
        }
        params["layers"].append(layer)
    return params


def stack_params(layers, n_heads):
    """Pack per-layer params into a few stacked arrays for the fused kernel.

    1/sqrt(dh) is folded into wq and bq here (offline weight transform)."""
    d_model = layers[0]["wq"].shape[0]
    scale = 1.0 / math.sqrt(d_model // n_heads)
    w_attn = jnp.stack([jnp.stack([l["wq"] * scale, l["wk"], l["wv"], l["wo"]])
                        for l in layers]).astype(jnp.bfloat16)        # (L,4,D,D)
    w_ff1 = jnp.stack([l["w1"] for l in layers]).astype(jnp.bfloat16)  # (L,D,H)
    w_ff2 = jnp.stack([l["w2"] for l in layers]).astype(jnp.bfloat16)  # (L,H,D)
    b1 = jnp.stack([l["b1"] for l in layers])                          # (L,1,H) f32
    vecs = jnp.stack([jnp.concatenate(
        [l["bq"] * scale, l["bk"], l["bv"], l["bo"],
         l["g1"], l["be1"], l["b2"], l["g2"], l["be2"]], axis=0)
        for l in layers])                                              # (L,9,D) f32
    return {"w_attn": w_attn, "w_ff1": w_ff1, "w_ff2": w_ff2,
            "b1": b1, "vecs": vecs}


def encoder_forward(tokens, src_mask, params, stacked, n_heads):
    B, S = tokens.shape
    D = params["emb_table"].shape[1]
    # TransformerEmbedding: token embedding gather + sinusoidal pos enc (dropout = identity)
    x = params["emb_table"][tokens] + params["pos_enc"][:S][None, :, :]
    x_flat = x.reshape(B * S, D).astype(jnp.float32)
    out_flat = encoder_stack_pallas(x_flat, src_mask.astype(jnp.float32),
                                    stacked, n_heads)
    return out_flat.reshape(B, S, D)


# ----------------------------------------------------------------------------
# Pure-JAX f32 reference (mirrors the PyTorch semantics) for a correctness check.
# ----------------------------------------------------------------------------
def _ref_layer(x, mask, p, n_heads):
    B, S, D = x.shape
    dh = D // n_heads

    def ln(y, g, b):
        mu = jnp.mean(y, -1, keepdims=True)
        var = jnp.mean((y - mu) ** 2, -1, keepdims=True)
        return (y - mu) / jnp.sqrt(var + 1e-12) * g[0] + b[0]

    q = x @ p["wq"] + p["bq"][0]
    k = x @ p["wk"] + p["bk"][0]
    v = x @ p["wv"] + p["bv"][0]
    q = q.reshape(B, S, n_heads, dh).transpose(0, 2, 1, 3)
    k = k.reshape(B, S, n_heads, dh).transpose(0, 2, 1, 3)
    v = v.reshape(B, S, n_heads, dh).transpose(0, 2, 1, 3)
    scores = jnp.einsum("bhqd,bhkd->bhqk", q, k) / math.sqrt(dh)
    scores = jnp.where(mask[:, None, :, :] == 0.0, -10000.0, scores)
    p_attn = jax.nn.softmax(scores, axis=-1)
    ctx = jnp.einsum("bhqk,bhkd->bhqd", p_attn, v)
    ctx = ctx.transpose(0, 2, 1, 3).reshape(B, S, D)
    attn_out = ctx @ p["wo"] + p["bo"][0]
    y = ln(x + attn_out, p["g1"], p["be1"])
    f = jnp.maximum(y @ p["w1"] + p["b1"][0], 0.0) @ p["w2"] + p["b2"][0]
    return ln(y + f, p["g2"], p["be2"])


def _ref_forward(tokens, src_mask, params, n_heads):
    S = tokens.shape[1]
    x = params["emb_table"][tokens] + params["pos_enc"][:S][None, :, :]
    for lp in params["layers"]:
        x = _ref_layer(x, src_mask, lp, n_heads)
    return x


if __name__ == "__main__":
    # Small shapes consistent with the module's forward
    enc_voc_size, max_len = 100, 16
    d_model, ffn_hidden, n_heads, n_layers = 32, 64, 4, 2
    B, S = 2, 8

    key = jax.random.PRNGKey(0)
    kp, kt = jax.random.split(key)
    params = init_params(kp, enc_voc_size, max_len, d_model, ffn_hidden, n_layers)
    stacked = stack_params(params["layers"], n_heads)

    tokens = jax.random.randint(kt, (B, S), 0, enc_voc_size, dtype=jnp.int32)
    # src_mask: (B, 1, S); batch 1 has its last two key positions padded out
    src_mask = jnp.ones((B, 1, S), jnp.float32)
    src_mask = src_mask.at[1, 0, S - 2:].set(0.0)

    out = encoder_forward(tokens, src_mask, params, stacked, n_heads)
    out = jax.block_until_ready(out)

    ref = _ref_forward(tokens, src_mask, params, n_heads)
    assert out.shape == (B, S, d_model)
    max_err = float(jnp.max(jnp.abs(out - ref)))
    # bf16 matmul inputs + approx reciprocal in softmax => allow a few % slack vs f32 ref
    assert jnp.allclose(out, ref, rtol=3e-2, atol=3e-2), \
        f"mismatch vs pure-JAX reference (max abs err {max_err})"

    print("KERNEL_OK")
</pallas_src>

<mosaic_0001>
module attributes {stable_mosaic.version = 11 : i64} {
  func.func @encoder_stack_kernel(%arg0: i32, %arg1: memref<16x32xf32, #tpu.memory_space<vmem>>, %arg2: memref<2x1x8xf32, #tpu.memory_space<vmem>>, %arg3: memref<1x4x32x32xbf16, #tpu.memory_space<vmem>>, %arg4: memref<1x32x64xbf16, #tpu.memory_space<vmem>>, %arg5: memref<1x64x32xbf16, #tpu.memory_space<vmem>>, %arg6: memref<1x1x64xf32, #tpu.memory_space<vmem>>, %arg7: memref<1x9x32xf32, #tpu.memory_space<vmem>>, %arg8: memref<16x32xf32, #tpu.memory_space<vmem>>) attributes {dimension_semantics = [#tpu.dimension_semantics<arbitrary>], iteration_bounds = array<i64: 2>, scalar_prefetch = 0 : i64, scratch_operands = 0 : i64, tpu.core_type = #tpu.core_type<tc>, window_params = [{pipeline_mode = #tpu.pipeline_mode<synchronous>, transform_indices = @transform_0, window_bounds = array<i64: 16, 32>}, {pipeline_mode = #tpu.pipeline_mode<synchronous>, transform_indices = @transform_1, window_bounds = array<i64: 2, 1, 8>}, {transform_indices = @transform_2, window_bounds = array<i64: 1, 4, 32, 32>}, {transform_indices = @transform_3, window_bounds = array<i64: 1, 32, 64>}, {transform_indices = @transform_4, window_bounds = array<i64: 1, 64, 32>}, {transform_indices = @transform_5, window_bounds = array<i64: 1, 1, 64>}, {transform_indices = @transform_6, window_bounds = array<i64: 1, 9, 32>}, {pipeline_mode = #tpu.pipeline_mode<synchronous>, transform_indices = @transform_7, window_bounds = array<i64: 16, 32>}]} {
    %c0_i32 = arith.constant 0 : i32
    %0 = arith.cmpi eq, %arg0, %c0_i32 : i32
    %1 = arith.extui %0 : i1 to i32
    %c0_i32_0 = arith.constant 0 : i32
    %2 = arith.cmpi ne, %1, %c0_i32_0 : i32
    scf.if %2 {
      %c0_60 = arith.constant 0 : index
      %c0_61 = arith.constant 0 : index
      %202 = vector.load %arg1[%c0_60, %c0_61] : memref<16x32xf32, #tpu.memory_space<vmem>>, vector<16x32xf32>
      %c0_62 = arith.constant 0 : index
      %c0_63 = arith.constant 0 : index
      %203 = vector.load %arg8[%c0_62, %c0_63] : memref<16x32xf32, #tpu.memory_space<vmem>>, vector<16x32xf32>
      tpu.vector_store %arg8[%c0_62, %c0_63], %202 {strides = array<i32>} : memref<16x32xf32, #tpu.memory_space<vmem>>, vector<16x32xf32>,
    } else {
    }
    %c0 = arith.constant 0 : index
    %c0_1 = arith.constant 0 : index
    %3 = vector.load %arg8[%c0, %c0_1] : memref<16x32xf32, #tpu.memory_space<vmem>>, vector<16x32xf32>
    %4 = arith.truncf %3 : vector<16x32xf32> to vector<16x32xbf16>
    %c0_2 = arith.constant 0 : index
    %c0_3 = arith.constant 0 : index
    %c0_4 = arith.constant 0 : index
    %c0_5 = arith.constant 0 : index
    %5 = vector.load %arg3[%c0_2, %c0_3, %c0_4, %c0_5] : memref<1x4x32x32xbf16, #tpu.memory_space<vmem>>, vector<1x4x32x32xbf16>
    %6 = vector.shape_cast %5 : vector<1x4x32x32xbf16> to vector<4x32x32xbf16>
    %7 = vector.extract_strided_slice %6 {offsets = [0, 0, 0], sizes = [1, 32, 32], strides = [1, 1, 1]} : vector<4x32x32xbf16> to vector<1x32x32xbf16>
    %8 = vector.shape_cast %7 : vector<1x32x32xbf16> to vector<32x32xbf16>
    %9 = vector.extract_strided_slice %6 {offsets = [1, 0, 0], sizes = [1, 32, 32], strides = [1, 1, 1]} : vector<4x32x32xbf16> to vector<1x32x32xbf16>
    %10 = vector.shape_cast %9 : vector<1x32x32xbf16> to vector<32x32xbf16>
    %11 = vector.extract_strided_slice %6 {offsets = [2, 0, 0], sizes = [1, 32, 32], strides = [1, 1, 1]} : vector<4x32x32xbf16> to vector<1x32x32xbf16>
    %12 = vector.shape_cast %11 : vector<1x32x32xbf16> to vector<32x32xbf16>
    %13 = vector.extract_strided_slice %6 {offsets = [3, 0, 0], sizes = [1, 32, 32], strides = [1, 1, 1]} : vector<4x32x32xbf16> to vector<1x32x32xbf16>
    %14 = vector.shape_cast %13 : vector<1x32x32xbf16> to vector<32x32xbf16>
    %c0_6 = arith.constant 0 : index
    %c0_7 = arith.constant 0 : index
    %c0_8 = arith.constant 0 : index
    %15 = vector.load %arg7[%c0_6, %c0_7, %c0_8] : memref<1x9x32xf32, #tpu.memory_space<vmem>>, vector<1x9x32xf32>
    %16 = vector.shape_cast %15 : vector<1x9x32xf32> to vector<9x32xf32>
    %17 = vector.extract_strided_slice %16 {offsets = [0, 0], sizes = [1, 32], strides = [1, 1]} : vector<9x32xf32> to vector<1x32xf32>
    %18 = vector.extract_strided_slice %16 {offsets = [1, 0], sizes = [1, 32], strides = [1, 1]} : vector<9x32xf32> to vector<1x32xf32>
    %19 = vector.extract_strided_slice %16 {offsets = [2, 0], sizes = [1, 32], strides = [1, 1]} : vector<9x32xf32> to vector<1x32xf32>
    %20 = vector.extract_strided_slice %16 {offsets = [3, 0], sizes = [1, 32], strides = [1, 1]} : vector<9x32xf32> to vector<1x32xf32>
    %21 = vector.extract_strided_slice %16 {offsets = [4, 0], sizes = [1, 32], strides = [1, 1]} : vector<9x32xf32> to vector<1x32xf32>
    %22 = vector.extract_strided_slice %16 {offsets = [5, 0], sizes = [1, 32], strides = [1, 1]} : vector<9x32xf32> to vector<1x32xf32>
    %23 = vector.extract_strided_slice %16 {offsets = [6, 0], sizes = [1, 32], strides = [1, 1]} : vector<9x32xf32> to vector<1x32xf32>
    %24 = vector.extract_strided_slice %16 {offsets = [7, 0], sizes = [1, 32], strides = [1, 1]} : vector<9x32xf32> to vector<1x32xf32>
    %25 = vector.extract_strided_slice %16 {offsets = [8, 0], sizes = [1, 32], strides = [1, 1]} : vector<9x32xf32> to vector<1x32xf32>
    %cst = arith.constant dense<0.000000e+00> : vector<16x32xf32>
    %26 = tpu.matmul %4, %8, %cst {dimension_numbers = #tpu.dot_dimension_numbers<[1], [0], [0], [1], [0, 0, 1, 1], [], []>} : vector<16x32xbf16>, vector<32x32xbf16>, vector<16x32xf32> -> vector<16x32xf32>
    %27 = vector.broadcast %17 : vector<1x32xf32> to vector<16x32xf32>
    %28 = arith.addf %26, %27 : vector<16x32xf32>
    %cst_9 = arith.constant dense<0.000000e+00> : vector<16x32xf32>
    %29 = tpu.matmul %4, %10, %cst_9 {dimension_numbers = #tpu.dot_dimension_numbers<[1], [0], [0], [1], [0, 0, 1, 1], [], []>} : vector<16x32xbf16>, vector<32x32xbf16>, vector<16x32xf32> -> vector<16x32xf32>
    %30 = vector.broadcast %18 : vector<1x32xf32> to vector<16x32xf32>
    %31 = arith.addf %29, %30 : vector<16x32xf32>
    %cst_10 = arith.constant dense<0.000000e+00> : vector<16x32xf32>
    %32 = tpu.matmul %4, %12, %cst_10 {dimension_numbers = #tpu.dot_dimension_numbers<[1], [0], [0], [1], [0, 0, 1, 1], [], []>} : vector<16x32xbf16>, vector<32x32xbf16>, vector<16x32xf32> -> vector<16x32xf32>
    %33 = vector.broadcast %19 : vector<1x32xf32> to vector<16x32xf32>
    %34 = arith.addf %32, %33 : vector<16x32xf32>
    %35 = vector.shape_cast %28 : vector<16x32xf32> to vector<2x8x32xf32>
    %36 = vector.shape_cast %31 : vector<16x32xf32> to vector<2x8x32xf32>
    %37 = vector.shape_cast %34 : vector<16x32xf32> to vector<2x8x32xf32>
    %c0_11 = arith.constant 0 : index
    %c0_12 = arith.constant 0 : index
    %c0_13 = arith.constant 0 : index
    %38 = vector.load %arg2[%c0_11, %c0_12, %c0_13] : memref<2x1x8xf32, #tpu.memory_space<vmem>>, vector<2x1x8xf32>
    %cst_14 = arith.constant 0.000000e+00 : f32
    %39 = vector.broadcast %cst_14 : f32 to vector<2x1x8xf32>
    %40 = arith.cmpf ogt, %38, %39 : vector<2x1x8xf32>
    %41 = vector.extract_strided_slice %35 {offsets = [0, 0, 0], sizes = [2, 8, 8], strides = [1, 1, 1]} : vector<2x8x32xf32> to vector<2x8x8xf32>
    %42 = arith.truncf %41 : vector<2x8x8xf32> to vector<2x8x8xbf16>
    %43 = vector.extract_strided_slice %36 {offsets = [0, 0, 0], sizes = [2, 8, 8], strides = [1, 1, 1]} : vector<2x8x32xf32> to vector<2x8x8xf32>
    %44 = arith.truncf %43 : vector<2x8x8xf32> to vector<2x8x8xbf16>
    %45 = vector.extract_strided_slice %37 {offsets = [0, 0, 0], sizes = [2, 8, 8], strides = [1, 1, 1]} : vector<2x8x32xf32> to vector<2x8x8xf32>
    %46 = arith.truncf %45 : vector<2x8x8xf32> to vector<2x8x8xbf16>
    "tpu.trace_start"() <{level = 10 : i32, message = "bqd,bkd->bqk"}> : () -> ()
    %cst_15 = arith.constant dense<0.000000e+00> : vector<2x8x8xf32>
    %47 = tpu.matmul %42, %44, %cst_15 {dimension_numbers = #tpu.dot_dimension_numbers<[2], [2], [1], [1], [0, 0, 0, 1, 1, 1], [0], [0]>} : vector<2x8x8xbf16>, vector<2x8x8xbf16>, vector<2x8x8xf32> -> vector<2x8x8xf32>
    %cst_16 = arith.constant -1.000000e+04 : f32
    "tpu.trace_stop"() : () -> ()
    %48 = vector.shape_cast %40 : vector<2x1x8xi1> to vector<2x1x8xi1>
    %49 = vector.broadcast %48 : vector<2x1x8xi1> to vector<2x8x8xi1>
    %50 = vector.broadcast %cst_16 : f32 to vector<2x8x8xf32>
    %51 = arith.select %49, %47, %50 : vector<2x8x8xi1>, vector<2x8x8xf32>
    %cst_17 = arith.constant dense<0xFF800000> : vector<2x8xf32>
    %52 = vector.multi_reduction <maximumf>, %51, %cst_17 [2] : vector<2x8x8xf32> to vector<2x8xf32>
    %53 = vector.shape_cast %52 : vector<2x8xf32> to vector<2x8x1xf32>
    %54 = vector.broadcast %53 : vector<2x8x1xf32> to vector<2x8x8xf32>
    %55 = arith.subf %51, %54 : vector<2x8x8xf32>
    %56 = math.exp %55 : vector<2x8x8xf32>
    %cst_18 = arith.constant dense<0.000000e+00> : vector<2x8xf32>
    %57 = vector.multi_reduction <add>, %56, %cst_18 [2] : vector<2x8x8xf32> to vector<2x8xf32>
    %58 = vector.shape_cast %57 : vector<2x8xf32> to vector<2x8x1xf32>
    %59 = tpu.reciprocal %58 {approx = true} : vector<2x8x1xf32> -> vector<2x8x1xf32>
    %60 = vector.broadcast %59 : vector<2x8x1xf32> to vector<2x8x8xf32>
    %61 = arith.mulf %56, %60 : vector<2x8x8xf32>
    %62 = arith.truncf %61 : vector<2x8x8xf32> to vector<2x8x8xbf16>
    "tpu.trace_start"() <{level = 10 : i32, message = "bqk,bkd->bqd"}> : () -> ()
    %cst_19 = arith.constant dense<0.000000e+00> : vector<2x8x8xf32>
    %63 = tpu.matmul %62, %46, %cst_19 {dimension_numbers = #tpu.dot_dimension_numbers<[2], [1], [1], [2], [0, 0, 0, 1, 1, 2], [0], [0]>} : vector<2x8x8xbf16>, vector<2x8x8xbf16>, vector<2x8x8xf32> -> vector<2x8x8xf32>
    "tpu.trace_stop"() : () -> ()
    %64 = vector.extract_strided_slice %35 {offsets = [0, 0, 8], sizes = [2, 8, 8], strides = [1, 1, 1]} : vector<2x8x32xf32> to vector<2x8x8xf32>
    %65 = arith.truncf %64 : vector<2x8x8xf32> to vector<2x8x8xbf16>
    %66 = vector.extract_strided_slice %36 {offsets = [0, 0, 8], sizes = [2, 8, 8], strides = [1, 1, 1]} : vector<2x8x32xf32> to vector<2x8x8xf32>
    %67 = arith.truncf %66 : vector<2x8x8xf32> to vector<2x8x8xbf16>
    %68 = vector.extract_strided_slice %37 {offsets = [0, 0, 8], sizes = [2, 8, 8], strides = [1, 1, 1]} : vector<2x8x32xf32> to vector<2x8x8xf32>
    %69 = arith.truncf %68 : vector<2x8x8xf32> to vector<2x8x8xbf16>
    "tpu.trace_start"() <{level = 10 : i32, message = "bqd,bkd->bqk"}> : () -> ()
    %cst_20 = arith.constant dense<0.000000e+00> : vector<2x8x8xf32>
    %70 = tpu.matmul %65, %67, %cst_20 {dimension_numbers = #tpu.dot_dimension_numbers<[2], [2], [1], [1], [0, 0, 0, 1, 1, 1], [0], [0]>} : vector<2x8x8xbf16>, vector<2x8x8xbf16>, vector<2x8x8xf32> -> vector<2x8x8xf32>
    %cst_21 = arith.constant -1.000000e+04 : f32
    "tpu.trace_stop"() : () -> ()
    %71 = vector.shape_cast %40 : vector<2x1x8xi1> to vector<2x1x8xi1>
    %72 = vector.broadcast %71 : vector<2x1x8xi1> to vector<2x8x8xi1>
    %73 = vector.broadcast %cst_21 : f32 to vector<2x8x8xf32>
    %74 = arith.select %72, %70, %73 : vector<2x8x8xi1>, vector<2x8x8xf32>
    %cst_22 = arith.constant dense<0xFF800000> : vector<2x8xf32>
    %75 = vector.multi_reduction <maximumf>, %74, %cst_22 [2] : vector<2x8x8xf32> to vector<2x8xf32>
    %76 = vector.shape_cast %75 : vector<2x8xf32> to vector<2x8x1xf32>
    %77 = vector.broadcast %76 : vector<2x8x1xf32> to vector<2x8x8xf32>
    %78 = arith.subf %74, %77 : vector<2x8x8xf32>
    %79 = math.exp %78 : vector<2x8x8xf32>
    %cst_23 = arith.constant dense<0.000000e+00> : vector<2x8xf32>
    %80 = vector.multi_reduction <add>, %79, %cst_23 [2] : vector<2x8x8xf32> to vector<2x8xf32>
    %81 = vector.shape_cast %80 : vector<2x8xf32> to vector<2x8x1xf32>
    %82 = tpu.reciprocal %81 {approx = true} : vector<2x8x1xf32> -> vector<2x8x1xf32>
    %83 = vector.broadcast %82 : vector<2x8x1xf32> to vector<2x8x8xf32>
    %84 = arith.mulf %79, %83 : vector<2x8x8xf32>
    %85 = arith.truncf %84 : vector<2x8x8xf32> to vector<2x8x8xbf16>
    "tpu.trace_start"() <{level = 10 : i32, message = "bqk,bkd->bqd"}> : () -> ()
    %cst_24 = arith.constant dense<0.000000e+00> : vector<2x8x8xf32>
    %86 = tpu.matmul %85, %69, %cst_24 {dimension_numbers = #tpu.dot_dimension_numbers<[2], [1], [1], [2], [0, 0, 0, 1, 1, 2], [0], [0]>} : vector<2x8x8xbf16>, vector<2x8x8xbf16>, vector<2x8x8xf32> -> vector<2x8x8xf32>
    "tpu.trace_stop"() : () -> ()
    %87 = vector.extract_strided_slice %35 {offsets = [0, 0, 16], sizes = [2, 8, 8], strides = [1, 1, 1]} : vector<2x8x32xf32> to vector<2x8x8xf32>
    %88 = arith.truncf %87 : vector<2x8x8xf32> to vector<2x8x8xbf16>
    %89 = vector.extract_strided_slice %36 {offsets = [0, 0, 16], sizes = [2, 8, 8], strides = [1, 1, 1]} : vector<2x8x32xf32> to vector<2x8x8xf32>
    %90 = arith.truncf %89 : vector<2x8x8xf32> to vector<2x8x8xbf16>
    %91 = vector.extract_strided_slice %37 {offsets = [0, 0, 16], sizes = [2, 8, 8], strides = [1, 1, 1]} : vector<2x8x32xf32> to vector<2x8x8xf32>
    %92 = arith.truncf %91 : vector<2x8x8xf32> to vector<2x8x8xbf16>
    "tpu.trace_start"() <{level = 10 : i32, message = "bqd,bkd->bqk"}> : () -> ()
    %cst_25 = arith.constant dense<0.000000e+00> : vector<2x8x8xf32>
    %93 = tpu.matmul %88, %90, %cst_25 {dimension_numbers = #tpu.dot_dimension_numbers<[2], [2], [1], [1], [0, 0, 0, 1, 1, 1], [0], [0]>} : vector<2x8x8xbf16>, vector<2x8x8xbf16>, vector<2x8x8xf32> -> vector<2x8x8xf32>
    %cst_26 = arith.constant -1.000000e+04 : f32
    "tpu.trace_stop"() : () -> ()
    %94 = vector.shape_cast %40 : vector<2x1x8xi1> to vector<2x1x8xi1>
    %95 = vector.broadcast %94 : vector<2x1x8xi1> to vector<2x8x8xi1>
    %96 = vector.broadcast %cst_26 : f32 to vector<2x8x8xf32>
    %97 = arith.select %95, %93, %96 : vector<2x8x8xi1>, vector<2x8x8xf32>
    %cst_27 = arith.constant dense<0xFF800000> : vector<2x8xf32>
    %98 = vector.multi_reduction <maximumf>, %97, %cst_27 [2] : vector<2x8x8xf32> to vector<2x8xf32>
    %99 = vector.shape_cast %98 : vector<2x8xf32> to vector<2x8x1xf32>
    %100 = vector.broadcast %99 : vector<2x8x1xf32> to vector<2x8x8xf32>
    %101 = arith.subf %97, %100 : vector<2x8x8xf32>
    %102 = math.exp %101 : vector<2x8x8xf32>
    %cst_28 = arith.constant dense<0.000000e+00> : vector<2x8xf32>
    %103 = vector.multi_reduction <add>, %102, %cst_28 [2] : vector<2x8x8xf32> to vector<2x8xf32>
    %104 = vector.shape_cast %103 : vector<2x8xf32> to vector<2x8x1xf32>
    %105 = tpu.reciprocal %104 {approx = true} : vector<2x8x1xf32> -> vector<2x8x1xf32>
    %106 = vector.broadcast %105 : vector<2x8x1xf32> to vector<2x8x8xf32>
    %107 = arith.mulf %102, %106 : vector<2x8x8xf32>
    %108 = arith.truncf %107 : vector<2x8x8xf32> to vector<2x8x8xbf16>
    "tpu.trace_start"() <{level = 10 : i32, message = "bqk,bkd->bqd"}> : () -> ()
    %cst_29 = arith.constant dense<0.000000e+00> : vector<2x8x8xf32>
    %109 = tpu.matmul %108, %92, %cst_29 {dimension_numbers = #tpu.dot_dimension_numbers<[2], [1], [1], [2], [0, 0, 0, 1, 1, 2], [0], [0]>} : vector<2x8x8xbf16>, vector<2x8x8xbf16>, vector<2x8x8xf32> -> vector<2x8x8xf32>
    "tpu.trace_stop"() : () -> ()
    %110 = vector.extract_strided_slice %35 {offsets = [0, 0, 24], sizes = [2, 8, 8], strides = [1, 1, 1]} : vector<2x8x32xf32> to vector<2x8x8xf32>
    %111 = arith.truncf %110 : vector<2x8x8xf32> to vector<2x8x8xbf16>
    %112 = vector.extract_strided_slice %36 {offsets = [0, 0, 24], sizes = [2, 8, 8], strides = [1, 1, 1]} : vector<2x8x32xf32> to vector<2x8x8xf32>
    %113 = arith.truncf %112 : vector<2x8x8xf32> to vector<2x8x8xbf16>
    %114 = vector.extract_strided_slice %37 {offsets = [0, 0, 24], sizes = [2, 8, 8], strides = [1, 1, 1]} : vector<2x8x32xf32> to vector<2x8x8xf32>
    %115 = arith.truncf %114 : vector<2x8x8xf32> to vector<2x8x8xbf16>
    "tpu.trace_start"() <{level = 10 : i32, message = "bqd,bkd->bqk"}> : () -> ()
    %cst_30 = arith.constant dense<0.000000e+00> : vector<2x8x8xf32>
    %116 = tpu.matmul %111, %113, %cst_30 {dimension_numbers = #tpu.dot_dimension_numbers<[2], [2], [1], [1], [0, 0, 0, 1, 1, 1], [0], [0]>} : vector<2x8x8xbf16>, vector<2x8x8xbf16>, vector<2x8x8xf32> -> vector<2x8x8xf32>
    %cst_31 = arith.constant -1.000000e+04 : f32
    "tpu.trace_stop"() : () -> ()
    %117 = vector.shape_cast %40 : vector<2x1x8xi1> to vector<2x1x8xi1>
    %118 = vector.broadcast %117 : vector<2x1x8xi1> to vector<2x8x8xi1>
    %119 = vector.broadcast %cst_31 : f32 to vector<2x8x8xf32>
    %120 = arith.select %118, %116, %119 : vector<2x8x8xi1>, vector<2x8x8xf32>
    %cst_32 = arith.constant dense<0xFF800000> : vector<2x8xf32>
    %121 = vector.multi_reduction <maximumf>, %120, %cst_32 [2] : vector<2x8x8xf32> to vector<2x8xf32>
    %122 = vector.shape_cast %121 : vector<2x8xf32> to vector<2x8x1xf32>
    %123 = vector.broadcast %122 : vector<2x8x1xf32> to vector<2x8x8xf32>
    %124 = arith.subf %120, %123 : vector<2x8x8xf32>
    %125 = math.exp %124 : vector<2x8x8xf32>
    %cst_33 = arith.constant dense<0.000000e+00> : vector<2x8xf32>
    %126 = vector.multi_reduction <add>, %125, %cst_33 [2] : vector<2x8x8xf32> to vector<2x8xf32>
    %127 = vector.shape_cast %126 : vector<2x8xf32> to vector<2x8x1xf32>
    %128 = tpu.reciprocal %127 {approx = true} : vector<2x8x1xf32> -> vector<2x8x1xf32>
    %129 = vector.broadcast %128 : vector<2x8x1xf32> to vector<2x8x8xf32>
    %130 = arith.mulf %125, %129 : vector<2x8x8xf32>
    %131 = arith.truncf %130 : vector<2x8x8xf32> to vector<2x8x8xbf16>
    "tpu.trace_start"() <{level = 10 : i32, message = "bqk,bkd->bqd"}> : () -> ()
    %cst_34 = arith.constant dense<0.000000e+00> : vector<2x8x8xf32>
    %132 = tpu.matmul %131, %115, %cst_34 {dimension_numbers = #tpu.dot_dimension_numbers<[2], [1], [1], [2], [0, 0, 0, 1, 1, 2], [0], [0]>} : vector<2x8x8xbf16>, vector<2x8x8xbf16>, vector<2x8x8xf32> -> vector<2x8x8xf32>
    "tpu.trace_stop"() : () -> ()
    %133 = tpu.concatenate %63, %86, %109, %132 in 2 : vector<2x8x8xf32>, vector<2x8x8xf32>, vector<2x8x8xf32>, vector<2x8x8xf32> -> vector<2x8x32xf32>
    %134 = vector.shape_cast %133 : vector<2x8x32xf32> to vector<16x32xf32>
    %135 = arith.truncf %134 : vector<16x32xf32> to vector<16x32xbf16>
    %cst_35 = arith.constant dense<0.000000e+00> : vector<16x32xf32>
    %136 = tpu.matmul %135, %14, %cst_35 {dimension_numbers = #tpu.dot_dimension_numbers<[1], [0], [0], [1], [0, 0, 1, 1], [], []>} : vector<16x32xbf16>, vector<32x32xbf16>, vector<16x32xf32> -> vector<16x32xf32>
    %137 = vector.broadcast %20 : vector<1x32xf32> to vector<16x32xf32>
    %138 = arith.addf %136, %137 : vector<16x32xf32>
    %139 = arith.addf %3, %138 : vector<16x32xf32>
    %cst_36 = arith.constant dense<0.000000e+00> : vector<16xf32>
    %140 = vector.multi_reduction <add>, %139, %cst_36 [1] : vector<16x32xf32> to vector<16xf32>
    %141 = vector.shape_cast %140 : vector<16xf32> to vector<16x1xf32>
    %cst_37 = arith.constant 3.200000e+01 : f32
    %142 = vector.broadcast %cst_37 : f32 to vector<16x1xf32>
    %143 = arith.divf %141, %142 : vector<16x1xf32>
    %144 = vector.broadcast %143 : vector<16x1xf32> to vector<16x32xf32>
    %145 = arith.subf %139, %144 : vector<16x32xf32>
    %146 = arith.mulf %145, %145 : vector<16x32xf32>
    %cst_38 = arith.constant dense<0.000000e+00> : vector<16xf32>
    %147 = vector.multi_reduction <add>, %146, %cst_38 [1] : vector<16x32xf32> to vector<16xf32>
    %148 = vector.shape_cast %147 : vector<16xf32> to vector<16x1xf32>
    %cst_39 = arith.constant 3.200000e+01 : f32
    %149 = vector.broadcast %cst_39 : f32 to vector<16x1xf32>
    %150 = arith.divf %148, %149 : vector<16x1xf32>
    %151 = vector.broadcast %143 : vector<16x1xf32> to vector<16x32xf32>
    %152 = arith.subf %139, %151 : vector<16x32xf32>
    %cst_40 = arith.constant 9.99999996E-13 : f32
    %153 = vector.broadcast %cst_40 : f32 to vector<16x1xf32>
    %154 = arith.addf %150, %153 : vector<16x1xf32>
    %155 = math.rsqrt %154 : vector<16x1xf32>
    %156 = vector.broadcast %155 : vector<16x1xf32> to vector<16x32xf32>
    %157 = arith.mulf %152, %156 : vector<16x32xf32>
    %158 = vector.broadcast %21 : vector<1x32xf32> to vector<16x32xf32>
    %159 = arith.mulf %157, %158 : vector<16x32xf32>
    %160 = vector.broadcast %22 : vector<1x32xf32> to vector<16x32xf32>
    %161 = arith.addf %159, %160 : vector<16x32xf32>
    %162 = arith.truncf %161 : vector<16x32xf32> to vector<16x32xbf16>
    %c0_41 = arith.constant 0 : index
    %c0_42 = arith.constant 0 : index
    %c0_43 = arith.constant 0 : index
    %163 = vector.load %arg4[%c0_41, %c0_42, %c0_43] : memref<1x32x64xbf16, #tpu.memory_space<vmem>>, vector<1x32x64xbf16>
    %164 = vector.shape_cast %163 : vector<1x32x64xbf16> to vector<32x64xbf16>
    %cst_44 = arith.constant dense<0.000000e+00> : vector<16x64xf32>
    %165 = tpu.matmul %162, %164, %cst_44 {dimension_numbers = #tpu.dot_dimension_numbers<[1], [0], [0], [1], [0, 0, 1, 1], [], []>} : vector<16x32xbf16>, vector<32x64xbf16>, vector<16x64xf32> -> vector<16x64xf32>
    %c0_45 = arith.constant 0 : index
    %c0_46 = arith.constant 0 : index
    %c0_47 = arith.constant 0 : index
    %166 = vector.load %arg6[%c0_45, %c0_46, %c0_47] : memref<1x1x64xf32, #tpu.memory_space<vmem>>, vector<1x1x64xf32>
    %167 = vector.shape_cast %166 : vector<1x1x64xf32> to vector<1x64xf32>
    %168 = vector.broadcast %167 : vector<1x64xf32> to vector<16x64xf32>
    %169 = arith.addf %165, %168 : vector<16x64xf32>
    %cst_48 = arith.constant 0.000000e+00 : f32
    %170 = vector.broadcast %cst_48 : f32 to vector<16x64xf32>
    %171 = arith.maximumf %169, %170 : vector<16x64xf32>
    %172 = arith.truncf %171 : vector<16x64xf32> to vector<16x64xbf16>
    %c0_49 = arith.constant 0 : index
    %c0_50 = arith.constant 0 : index
    %c0_51 = arith.constant 0 : index
    %173 = vector.load %arg5[%c0_49, %c0_50, %c0_51] : memref<1x64x32xbf16, #tpu.memory_space<vmem>>, vector<1x64x32xbf16>
    %174 = vector.shape_cast %173 : vector<1x64x32xbf16> to vector<64x32xbf16>
    %cst_52 = arith.constant dense<0.000000e+00> : vector<16x32xf32>
    %175 = tpu.matmul %172, %174, %cst_52 {dimension_numbers = #tpu.dot_dimension_numbers<[1], [0], [0], [1], [0, 0, 1, 1], [], []>} : vector<16x64xbf16>, vector<64x32xbf16>, vector<16x32xf32> -> vector<16x32xf32>
    %176 = vector.broadcast %23 : vector<1x32xf32> to vector<16x32xf32>
    %177 = arith.addf %175, %176 : vector<16x32xf32>
    %178 = arith.addf %161, %177 : vector<16x32xf32>
    %cst_53 = arith.constant dense<0.000000e+00> : vector<16xf32>
    %179 = vector.multi_reduction <add>, %178, %cst_53 [1] : vector<16x32xf32> to vector<16xf32>
    %180 = vector.shape_cast %179 : vector<16xf32> to vector<16x1xf32>
    %cst_54 = arith.constant 3.200000e+01 : f32
    %181 = vector.broadcast %cst_54 : f32 to vector<16x1xf32>
    %182 = arith.divf %180, %181 : vector<16x1xf32>
    %183 = vector.broadcast %182 : vector<16x1xf32> to vector<16x32xf32>
    %184 = arith.subf %178, %183 : vector<16x32xf32>
    %185 = arith.mulf %184, %184 : vector<16x32xf32>
    %cst_55 = arith.constant dense<0.000000e+00> : vector<16xf32>
    %186 = vector.multi_reduction <add>, %185, %cst_55 [1] : vector<16x32xf32> to vector<16xf32>
    %187 = vector.shape_cast %186 : vector<16xf32> to vector<16x1xf32>
    %cst_56 = arith.constant 3.200000e+01 : f32
    %188 = vector.broadcast %cst_56 : f32 to vector<16x1xf32>
    %189 = arith.divf %187, %188 : vector<16x1xf32>
    %190 = vector.broadcast %182 : vector<16x1xf32> to vector<16x32xf32>
    %191 = arith.subf %178, %190 : vector<16x32xf32>
    %cst_57 = arith.constant 9.99999996E-13 : f32
    %192 = vector.broadcast %cst_57 : f32 to vector<16x1xf32>
    %193 = arith.addf %189, %192 : vector<16x1xf32>
    %194 = math.rsqrt %193 : vector<16x1xf32>
    %195 = vector.broadcast %194 : vector<16x1xf32> to vector<16x32xf32>
    %196 = arith.mulf %191, %195 : vector<16x32xf32>
    %197 = vector.broadcast %24 : vector<1x32xf32> to vector<16x32xf32>
    %198 = arith.mulf %196, %197 : vector<16x32xf32>
    %199 = vector.broadcast %25 : vector<1x32xf32> to vector<16x32xf32>
    %200 = arith.addf %198, %199 : vector<16x32xf32>
    %c0_58 = arith.constant 0 : index
    %c0_59 = arith.constant 0 : index
    %201 = vector.load %arg8[%c0_58, %c0_59] : memref<16x32xf32, #tpu.memory_space<vmem>>, vector<16x32xf32>
    tpu.vector_store %arg8[%c0_58, %c0_59], %200 {strides = array<i32>} : memref<16x32xf32, #tpu.memory_space<vmem>>, vector<16x32xf32>,
    return
  }
  func.func @transform_0(%arg0: i32) -> (i32, i32) {
    %c0_i32 = arith.constant 0 : i32
    %c0_i32_0 = arith.constant 0 : i32
    %c0_i32_1 = arith.constant 0 : i32
    return %c0_i32, %c0_i32_0 : i32, i32
  }
  func.func @transform_1(%arg0: i32) -> (i32, i32, i32) {
    %c0_i32 = arith.constant 0 : i32
    %c0_i32_0 = arith.constant 0 : i32
    %c0_i32_1 = arith.constant 0 : i32
    %c0_i32_2 = arith.constant 0 : i32
    return %c0_i32, %c0_i32_0, %c0_i32_1 : i32, i32, i32
  }
  func.func @transform_2(%arg0: i32) -> (i32, i32, i32, i32) {
    %c0_i32 = arith.constant 0 : i32
    %c0_i32_0 = arith.constant 0 : i32
    %c0_i32_1 = arith.constant 0 : i32
    %c0_i32_2 = arith.constant 0 : i32
    return %arg0, %c0_i32, %c0_i32_0, %c0_i32_1 : i32, i32, i32, i32
  }
  func.func @transform_3(%arg0: i32) -> (i32, i32, i32) {
    %c0_i32 = arith.constant 0 : i32
    %c0_i32_0 = arith.constant 0 : i32
    %c0_i32_1 = arith.constant 0 : i32
    return %arg0, %c0_i32, %c0_i32_0 : i32, i32, i32
  }
  func.func @transform_4(%arg0: i32) -> (i32, i32, i32) {
    %c0_i32 = arith.constant 0 : i32
    %c0_i32_0 = arith.constant 0 : i32
    %c0_i32_1 = arith.constant 0 : i32
    return %arg0, %c0_i32, %c0_i32_0 : i32, i32, i32
  }
  func.func @transform_5(%arg0: i32) -> (i32, i32, i32) {
    %c0_i32 = arith.constant 0 : i32
    %c0_i32_0 = arith.constant 0 : i32
    %c0_i32_1 = arith.constant 0 : i32
    return %arg0, %c0_i32, %c0_i32_0 : i32, i32, i32
  }
  func.func @transform_6(%arg0: i32) -> (i32, i32, i32) {
    %c0_i32 = arith.constant 0 : i32
    %c0_i32_0 = arith.constant 0 : i32
    %c0_i32_1 = arith.constant 0 : i32
    return %arg0, %c0_i32, %c0_i32_0 : i32, i32, i32
  }
  func.func @transform_7(%arg0: i32) -> (i32, i32) {
    %c0_i32 = arith.constant 0 : i32
    %c0_i32_0 = arith.constant 0 : i32
    %c0_i32_1 = arith.constant 0 : i32
    return %c0_i32, %c0_i32_0 : i32, i32
  }
}

</mosaic_0001>

<bundles_post_ra>
// kernel: tpu_custom_call.1
= control target key start
LH: loop header
LB: loop body
LE: loop exit
PB: predicated region body
PF: predicated region fallthrough
CT: control target
= control target key end

     0   :  { %12 = vsyncpa [#allocation3], 0  ;;  %s3101_s0 = inlined_call_operand.hbm [shape: f32[16,32], index: 0, kind: input, shape index: {}]   ;;  %s3102_s1 = inlined_call_operand.hbm [shape: f32[2,1,8], index: 1, kind: input, shape index: {}]   ;;  %s3103_s2 = inlined_call_operand.vmem [shape: bf16[2,4,32,32], index: 2, kind: input, shape index: {}]   ;;  %s3104_s3 = inlined_call_operand.hbm [shape: bf16[2,32,64], index: 3, kind: input, shape index: {}]   ;;  %s3105_s4 = inlined_call_operand.vmem [shape: bf16[2,64,32], index: 4, kind: input, shape index: {}]   ;;  %s3106_s5 = inlined_call_operand.vmem [shape: f32[2,1,64], index: 5, kind: input, shape index: {}]   ;;  %s3107_s6 = inlined_call_operand.vmem [shape: f32[2,9,32], index: 6, kind: input, shape index: {}]   ;;  %s3108_s7 = inlined_call_operand.hbm [shape: f32[16,32], index: 7, kind: output, shape index: {}]  }
   0x1   :  { %13 = vsyncpa [#allocation6], 0 }
   0x2   :  { %14 = vsyncpa [#allocation4], 0  ;;  %s2586_s24 = smov 0   ;;  %s2588_s25 = smov 0  }
   0x3   :  { %s2590_s26 = smov 0   ;;  %s2592_s27 = smov 0  }
   0x4 LB: > { %s2605_s28 = sadd.s32 4294967295, %s2524_s27   ;;  %s2608_s29 = sadd.s32 1, %s2524_s27   ;;  %s2524_s27 = sphi %s2592_s27, %s3135_s27   ;;  %s2520_s26 = sphi %s2590_s26, %s3134_s26   ;;  %s2516_s25 = sphi %s2588_s25, %s3133_s25   ;;  %s2512_s24 = sphi %s2586_s24, %s3132_s24  }
   0x5   : > { %s92_s30 = ssub.s32 %s2524_s27, %s2608_s29  ;;  %s95_s8 = sadd.s32 1, %s2520_s26 }
   0x6   : > { %p93_p0 = scmp.eq.s32.totalorder %s92_s30, 0  ;;  %p102_p1 = scmp.ne.s32.totalorder %s2520_s26, %s2516_s25 }
   0x7   : > { %p103_p2 = scmp.eq.s32.totalorder %s2524_s27, 0  ;;  %p108_p3 = scmp.ne.s32.totalorder %s2516_s25, %s2512_s24 }
   0x8   : > { %s2618_s9 = scalar_select %p93_p0, %s2520_s26, %s95_s8  }
   0x9   : > { %p2620_p4 = por %p103_p2, %p102_p1  ;;  %p3109_p5 = scmp.eq.s32.totalorder %s2605_s28, 0 }
   0xa   : > { %3113 = sst [smem:[#allocation13_spill]] %s2618_s9  ;;  %p1950_p6 = scmp.ge.s32.totalorder %s2524_s27, 1 }
   0xb   : > { %p218_p7 = scmp.lt.s32.totalorder %s2524_s27, 3  ;;  %p2629_p8 = por %p3109_p5, %p108_p3 }
   0xc   : > { %s2526_s13 = smov [#allocation2]   ;;  %p2241_p13 = scmp.lt.s32.totalorder %s2524_s27, 2 }
   0xd   : > { %s3115_s11 = scalar_select %p2629_p8, 1, 0 }
   0xe   : > { %p2634_p10 = pnand %p1950_p6, %p218_p7  ;;  %s230_s14 = sshll.u32 %s2526_s13, 4  ;;  %s231_s14 = int_to_ptr.vmem [resolvable:$true] %s230_s14 }
   0xf   : > { %p2649_p0 = pnand %p2241_p13, %p2620_p4  ;;  %s2366_s19 = scalar_lea.hbm %s3101_s0, 256 }
  0x10   : > { %s3116_s12 = scalar_select %p2634_p10, 1, 0 }
  0x11   : > { %p2228_p11 = pneg %p2634_p10  ;;  %p2367_p1 = scmp.ne.s32.totalorder %s3101_s0, %s2366_s19 }
  0x12   : > { %s3118_s16 = scalar_select %p2649_p0, 1, 0 }
  0x13   : > { %p2642_p12 = pnand %p2228_p11, %p3109_p5  ;;  %p2373_p4 = scmp.lt.u32.totalorder %s2366_s19, %s3101_s0 }
  0x15   : > { %p2368_p2 = pneg %p2642_p12 }
  0x17   : > { %p2369_p3 = pnand %p2368_p2, %p2367_p1 }
  0x19   : > { %p2370_p6 = pneg %p2369_p3 }
  0x1b   : > { %p2375_p7 = pnand %p2373_p4, %p2370_p6 }
  0x1d   : > { %2378 = shalt.err (!%p2375_p7)
}
  0x1e   : > { %s2379_s24 = scalar_lea.vmem %s231_s14, 256  ;;  %p2387_p5 = scmp.lt.s32.totalorder %s231_s14, %s231_s14 }
  0x1f   : > { %p2380_p11 = scmp.ne.s32.totalorder %s231_s14, %s2379_s24  ;;  %p2388_p8 = scmp.lt.s32.totalorder %s2379_s24, %s2379_s24 }
  0x21   : > { %p2382_p13 = pnand %p2380_p11, %p2368_p2  ;;  %p2389_p10 = por %p2388_p8, %p2387_p5 }
  0x23   : > { %p2383_p9 = pneg %p2382_p13 }
  0x25   : > { %p2390_p0 = pnand %p2389_p10, %p2383_p9 }
  0x27   : > { %2393 = shalt.err (!%p2390_p0)
}
  0x28   : > { %s2527_s30 = smov 128   ;;  %s2528_s8 = smov 8  }
  0x29   : > { %2231 = dma.hbm_to_vmem [thread:$0]  (!%p2642_p12), %s3101_s0, 256, %s231_s14, [#allocation3], %s2527_s30, %s2527_s30, %s2528_s8  }
  0x2a   : > { %s2529_s17 = smov [#allocation5]   ;;  %s2394_s21 = scalar_lea.hbm %s3102_s1, 32 }
  0x2b   : > { %s243_s18 = sshll.u32 %s2529_s17, 4  ;;  %p2395_p5 = scmp.ne.s32.totalorder %s3102_s1, %s2394_s21  ;;  %s244_s18 = int_to_ptr.vmem [resolvable:$true] %s243_s18 }
  0x2c   : > { %p2401_p10 = scmp.lt.u32.totalorder %s2394_s21, %s3102_s1 }
  0x2d   : > { %p2397_p8 = pnand %p2395_p5, %p2368_p2 }
  0x2f   : > { %p2398_p9 = pneg %p2397_p8 }
  0x31   : > { %p2403_p0 = pnand %p2401_p10, %p2398_p9 }
  0x33   : > { %2406 = shalt.err (!%p2403_p0)
}
  0x34   : > { %s2407_s14 = scalar_lea.vmem %s244_s18, 32  ;;  %p2415_p4 = scmp.lt.s32.totalorder %s244_s18, %s244_s18 }
  0x35   : > { %p2408_p1 = scmp.ne.s32.totalorder %s244_s18, %s2407_s14  ;;  %p2416_p7 = scmp.lt.s32.totalorder %s2407_s14, %s2407_s14 }
  0x37   : > { %p2410_p3 = pnand %p2408_p1, %p2368_p2  ;;  %p2417_p11 = por %p2416_p7, %p2415_p4 }
  0x39   : > { %p2411_p6 = pneg %p2410_p3 }
  0x3b   : > { %p2418_p13 = pnand %p2417_p11, %p2411_p6 }
  0x3d   : > { %2421 = shalt.err (!%p2418_p13)
}
  0x3e   : > { %s2530_s30 = smov 16   ;;  %s2531_s9 = smov 1  }
  0x3f   : > { %2234 = dma.hbm_to_vmem [thread:$0]  (!%p2642_p12), %s3102_s1, 32, %s244_s18, [#allocation6], %s2530_s30, %s2530_s30, %s2531_s9  }
  0x40   : > { %s265_s13 = sand.u32 1, %s2524_s27   ;;  %s267_s17 = sand.u32 1, %s2520_s26  }
  0x41   : > { %s1954_s19 = sshll.u32 %s267_s17, 4  ;;  %s2010_s20 = sshll.u32 %s2524_s27, 8 }
  0x42   : > { %s2701_s23 = scalar_lea.hbm %s3104_s3, %s2010_s20  ;;  %s269_s24 = scalar_lea.vmem [#allocation7], %s1954_s19 }
  0x43   : > { %s276_s14 = sshll.u32 %s269_s24, 4  ;;  %s2705_s15 = scalar_lea.sflag [#allocation3], %s265_s13  ;;  %s2703_s14 = int_to_ptr.vmem [resolvable:$true] %s276_s14 }
  0x44   : > { %s2422_s18 = scalar_lea.hbm %s2701_s23, 256  ;;  %p3119_p2 = scmp.ne.s32.totalorder %s3118_s16, 0 }
  0x45   : > { %p2423_p12 = scmp.ne.s32.totalorder %s2701_s23, %s2422_s18  ;;  %s2427_s9 = scalar_lea.hbm %s3104_s3, 512 }
  0x46   : > { %p2424_p5 = pneg %p3119_p2  ;;  %p2428_p10 = scmp.lt.u32.totalorder %s2701_s23, %s3104_s3 }
  0x47   : > { %p2429_p0 = scmp.lt.u32.totalorder %s2427_s9, %s2422_s18  ;;  %p2431_p3 = scmp.lt.u32.totalorder %s2422_s18, %s2701_s23 }
  0x48   : > { %p2425_p8 = pnand %p2424_p5, %p2423_p12 }
  0x49   : > { %p2430_p1 = por %p2429_p0, %p2428_p10 }
  0x4a   : > { %p2426_p9 = pneg %p2425_p8 }
  0x4b   : > { %p2432_p6 = por %p2431_p3, %p2430_p1 }
  0x4d   : > { %p2433_p4 = pnand %p2432_p6, %p2426_p9 }
  0x4f   : > { %2436 = shalt.err (!%p2433_p4)
}
  0x50   : > { %s2437_s13 = scalar_lea.vmem %s2703_s14, 256  ;;  %s2532_s17 = smov [#allocation7]  }
  0x51   : > { %p2438_p7 = scmp.ne.s32.totalorder %s2703_s14, %s2437_s13  ;;  %s2442_s19 = sshll.u32 %s2532_s17, 4  ;;  %s2443_s19 = int_to_ptr.vmem [resolvable:$false] %s2442_s19 }
  0x52   : > { %s2444_s20 = scalar_lea.vmem %s2443_s19, 512  ;;  %p2445_p12 = scmp.lt.s32.totalorder %s2703_s14, %s2443_s19 }
  0x53   : > { %p2440_p11 = pnand %p2438_p7, %p2424_p5  ;;  %p2446_p8 = scmp.lt.s32.totalorder %s2444_s20, %s2437_s13 }
  0x55   : > { %p2441_p13 = pneg %p2440_p11  ;;  %p2447_p10 = por %p2446_p8, %p2445_p12 }
  0x57   : > { %p2448_p0 = pnand %p2447_p10, %p2441_p13 }
  0x59   : > { %2451 = shalt.err (!%p2448_p0)
}
  0x5a   : > { %s2533_s21 = smov 64   ;;  %s2534_s22 = smov 4  }
  0x5b   : > { %2238 = dma.hbm_to_vmem [thread:$0]  (!%p3119_p2), %s2701_s23, 256, %s2703_s14, %s2705_s15, %s2533_s21, %s2533_s21, %s2534_s22  }
  0x5c   : > { %p3120_p5 = scmp.ne.s32.totalorder %s3116_s12, 0 }
  0x5d   : > { %p3121_p9 = scmp.eq.s32.totalorder (!%p3120_p5), %s2605_s28, 0 }
  0x5e   : > { %310 = sbr.rel (%p3120_p5) target bundleno = 4138 (0x102a), region = 48 }
  0x65   : > { %2495 = dma.done.wait (%p3121_p9), [#allocation3], 256   ;;  %p3122_p1 = pmov %p3121_p9 }
  0x67   : > { %2497 = vsyncadd (%p3122_p1), [#allocation3], 4294967040  ;;  %p3123_p3 = pmov %p3122_p1 }
  0x68   : > { %p3124_p6 = pmov %p3122_p1 }
  0x69   : > { %2499 = dma.done.wait (%p3123_p3), [#allocation6], 32  }
  0x6a   : > { %2501 = vsyncadd (%p3124_p6), [#allocation6], 4294967264  ;;  %s320_s16 = sand.u32 1, %s2605_s28   ;;  %s322_s23 = sand.u32 1, %s2516_s25  }
  0x6b   : > { %s2745_s24 = sshll.u32 %s322_s23, 4  ;;  %s321_s12 = scalar_lea.sflag [#allocation3], %s320_s16 }
  0x6c   : > { %s324_s14 = scalar_lea.vmem [#allocation7], %s2745_s24  ;;  %p3125_p2 = scmp.ne.s32.totalorder %s3115_s11, 0 }
  0x6e   : > { %2503 = dma.done.wait (%p3125_p2), %s321_s12, 256  }
  0x6f   : > { %2505 = vsyncadd (%p3125_p2), %s321_s12, 4294967040  ;;  %p368_p4 = scmp.lt.s32.totalorder %s2605_s28, 1  ;;  %p3126_p7 = scmp.ne.s32.totalorder %s2605_s28, 0 }
  0x70   : > { %v391_v0 = vld [vmem:[#allocation2] sm:$0xff] (!%p3126_p7)  ;;  %vm393_vm0 = vcmask (!%p3126_p7), 261120   ;;  %v392_v1 = vld [vmem:[#allocation2 + $0x8] sm:$0xff] (!%p3126_p7) }
  0x71   : > { %s2754_s15 = scalar_select %p368_p4, %s2605_s28, 1 }
  0x72   : > { %390 = sbr.rel (%p3126_p7) target bundleno = 121 (0x79), region = 64  ;;  %394 = vst.msk [vmem:[#allocation8] sm:$0xff] (!%p3126_p7), %vm393_vm0, %v391_v0  ;;  %395 = vst.msk [vmem:[#allocation8 + $0x8] sm:$0xff] (!%p3126_p7), %vm393_vm0, %v392_v1 }
  0x73   : > { %s2011_s18 = sshll.u32 %s2754_s15, 6  ;;  %s2012_s27 = sshll.u32 %s2754_s15, 5 }
  0x74   : > { %s2761_s8 = scalar_lea.vmem %s3103_s2, %s2011_s18  ;;  %s2766_s11 = scalar_lea.vmem %s3105_s4, %s2012_s27 }
  0x75   : > { %s380_s20 = scalar_lea.vmem %s3106_s5, %s2754_s15  ;;  %s2013_s21 = sshll.u32 %s2754_s15, 4 }
  0x76   : > { %s2776_s23 = scalar_lea.vmem %s3107_s6, %s2013_s21 }
  0x79 PF: > { %v2312_v2 = vld [vmem:[%s2761_s8 + $0x10] sm:$0xff]   ;;  %v2535_v3 = vmov 0.0   ;;  %v2313_v4 = vld [vmem:[%s2761_s8 + $0x18] sm:$0xff]   ;;  %v2314_v5 = vld [vmem:[%s2761_s8] sm:$0xff]   ;;  %vm2536_vm1 = vmmov 0   ;;  %vm433_vm2 = vcmask 261120   ;;  %v417_v12 = vlaneseq }
  0x7a   : > { %2074 = vmatprep.subr.bf16.mxu1 %v2535_v3  ;;  %2066 = vmatprep.subr.bf16.mxu0 %v2535_v3  ;;  %v2788_v6 = vld [vmem:[#allocation8] sm:$0xff]  ;;  %v2790_v7 = vld [vmem:[#allocation8 + $0x8] sm:$0xff]  ;;  %v2315_v8 = vld [vmem:[%s2761_s8 + $0x8] sm:$0xff]   ;;  %vm602_vm3 = vcmask 64512   ;;  %s2537_s12 = smov 120   ;;  %vm736_vm4 = vcmask 1043456  }
  0x7b   : > { %2075 = vmatpush3.bf16.msra.mxu1 %v2312_v2  ;;  %2078 = vmatprep.mubr.msk.bf16.mxu1 %vm2536_vm1, %v2535_v3  ;;  %v398_v9 = vpack.c.bf16 %v2790_v7, %v2788_v6  ;;  %v2316_v10 = vld [vmem:[%s2761_s8 + $0x20] sm:$0xff]   ;;  %v2317_v11 = vld [vmem:[%s2761_s8 + $0x28] sm:$0xff]   ;;  %v2813_v13 = vshrl.u32 %v417_v12, 7  ;;  %v592_v49 = vld [vmem:[#allocation5] sm:$0x1]  ;;  %v2538_v51 = vmov 0  }
  0x7c   : > { %2076 = vmatprep.subr.bf16.mxu1 %v2535_v3  ;;  %2070 = vmatprep.mubr.msk.bf16.mxu0 %vm2536_vm1, %v2535_v3  ;;  %v2817_v15 = vld [vmem:[%s2776_s23] sm:$0xff]  ;;  %v593_v50 = vld [vmem:[#allocation5 + $0x1] sm:$0x1]  ;;  %vm594_vm5 = vcmp.gt.f32.partialorder %v592_v49, 0.0  ;;  %s2539_s18 = smov 112   ;;  %s2540_s27 = smov 104  }
  0x7d   : > { %2067 = vmatpush3.bf16.msra.mxu0 %v2314_v5  ;;  %v480_v14 = vsub.s32 1, %v2813_v13  ;;  %v419_v17 = vsub.s32 0, %v2813_v13  ;;  %v537_v41 = vsub.s32 2, %v2813_v13  ;;  %vm595_vm6 = vcmp.gt.f32.partialorder %v593_v50, 0.0  ;;  %s2541_s30 = smov 8   ;;  %s2542_s9 = smov 16  }
  0x7e   : > { %2068 = vmatprep.subr.bf16.mxu0 %v2535_v3  ;;  %v695_v52 = vsel %vm594_vm5, 1, %v2538_v51  ;;  %v696_v53 = vsel %vm595_vm6, 1, %v2538_v51  ;;  %s2543_s10 = smov 24   ;;  %vm1524_vm9 = vcmask 130048   ;;  %vm1527_vm10 = vcmask 195584   ;;  %s2544_s15 = smov [#allocation8]  }
  0x7f   : > { %2077 = vmatpush3.bf16.msra.mxu1 %v2313_v4  ;;  %v481_v16 = vrot.slane %v2817_v15, %v480_v14  ;;  %v420_v21 = vrot.slane %v2817_v15, %v419_v17  ;;  %v538_v42 = vrot.slane %v2817_v15, %v537_v41  ;;  %v700_v54 = vrot.slane %v695_v52, %v419_v17  ;;  %p2244_p11 = scmp.eq.s32.totalorder %s2605_s28, 1 }
  0x80   : > { %2090 = vmatprep.subr.bf16.mxu1 %v2535_v3  ;;  %v704_v55 = vrot.slane %v696_v53, %v419_v17  ;;  %vm1739_vm11 = vcmask 523264  }
  0x81   : > { %2069 = vmatpush3.bf16.msra.mxu0 %v2315_v8  ;;  %vm2858_vm7 = vcmp.eq.s32.totalorder %v700_v54, 1 }
  0x82   : > { %2079 = vmatmul.mubr.msk.bf16.vlgmr.msra.gmra.mrb[0].mxu1 %vm433_vm2, %v398_v9  ;;  %2082 = vmatprep.subr.bf16.mxu0 %v2535_v3  ;;  %vm2862_vm8 = vcmp.eq.s32.totalorder %v704_v55, 1 }
  0x83   : > { %2092 = vmatprep.mubr.msk.bf16.mxu1 %vm2536_vm1, %v2535_v3 }
  0x84   : > { %2071 = vmatmul.mubr.msk.bf16.vlgmr.msra.gmra.mrb[0].mxu0 %vm433_vm2, %v398_v9 }
  0x85   : > { %2083 = vmatpush3.bf16.msra.mxu0 %v2316_v10  ;;  %2086 = vmatprep.mubr.msk.bf16.mxu0 %vm2536_vm1, %v2535_v3 }
  0x86   : > { %2084 = vmatprep.subr.bf16.mxu0 %v2535_v3 }
  0x89   : > { %2085 = vmatpush3.bf16.msra.mxu0 %v2317_v11 }
  0x8a   : > { %2096 = vmatprep.subr.bf16.mxu0 %v2535_v3 }
  0x8c   : > { %2087 = vmatmul.mubr.msk.bf16.vlgmr.msra.gmra.mrb[4].mxu0 %vm433_vm2, %v398_v9 }
  0x8d   : > { %2098 = vmatprep.mubr.msk.bf16.mxu0 %vm2536_vm1, %v2535_v3 }
 0x155   : > { %v528_v18 = vpop.f32.mrb[0].mxu1 }
 0x156   : > { %v529_v19 = vadd.f32 %v528_v18, %v481_v16  ;;  %v2080_v20 = vpop.f32.mrb[1].mxu1 }
 0x157   : > { %v531_v22 = vpop.f32.mrb[2].mxu1  ;;  %v471_v23 = vpop.f32.mrb[0].mxu0 }
 0x158   : > { %v2822_v24 = vpack.c.bf16 %v529_v19, %v529_v19  ;;  %v532_v25 = vadd.f32 %v531_v22, %v481_v16  ;;  %v2081_v26 = vpop.f32.mrb[3].mxu1  ;;  %v2072_v27 = vpop.f32.mrb[1].mxu0  ;;  %v472_v30 = vadd.f32 %v471_v23, %v420_v21 }
 0x159   : > { %v474_v28 = vpop.f32.mrb[2].mxu0 }
 0x15a   : > { %v2824_v29 = vpack.c.bf16 %v532_v25, %v532_v25  ;;  %v607_v31 = vsel %vm602_vm3, %v2822_v24, 0  ;;  %v2073_v32 = vpop.f32.mrb[3].mxu0  ;;  %v2833_v34 = vpack.c.bf16 %v472_v30, %v472_v30  ;;  %v475_v35 = vadd.f32 %v474_v28, %v420_v21 }
 0x15b   : > { %2091 = vmatpush3.bf16.xpose.msra.mxu1 %v607_v31 }
 0x15c   : > { %882 = vrot.lane.b32.xlu1 %v2824_v29, %s2537_s12  ;;  %v653_v33 = vsel %vm602_vm3, %v2824_v29, 0  ;;  %2102 = vmatprep.subr.bf16.mxu1 %v2535_v3  ;;  %v2836_v39 = vpack.c.bf16 %v475_v35, %v475_v35 }
 0x15d   : > { %2097 = vmatpush3.bf16.xpose.msra.mxu0 %v653_v33 }
 0x15e   : > { %2108 = vmatprep.subr.bf16.mxu0 %v2535_v3 }
 0x15f   : > { %v585_v36 = vpop.f32.mrb[4].mxu0 }
 0x160   : > { %v2088_v37 = vpop.f32.mrb[5].mxu0  ;;  %v586_v43 = vadd.f32 %v585_v36, %v538_v42 }
 0x161   : > { %v588_v38 = vpop.f32.mrb[6].mxu0 }
 0x162   : > { %2093 = vmatmul.mubr.msk.bf16.vlgmr.msra.gmra.mrb[4].mxu1 %vm602_vm3, %v2833_v34  ;;  %v2089_v40 = vpop.f32.mrb[7].mxu0  ;;  %v589_v44 = vadd.f32 %v588_v38, %v538_v42  ;;  %v2848_v45 = vpack.c.bf16 %v586_v43, %v586_v43 }
 0x163   : > { %2104 = vmatprep.mubr.msk.bf16.mxu1 %vm2536_vm1, %v2535_v3 }
 0x164   : > { %2099 = vmatmul.mubr.msk.bf16.vlgmr.msra.gmra.mrb[8].mxu0 %vm602_vm3, %v2836_v39  ;;  %v2850_v46 = vpack.c.bf16 %v589_v44, %v589_v44  ;;  %v738_v47 = vsel %vm736_vm4, %v2848_v45, 0 }
 0x165   : > { %2110 = vmatprep.mubr.msk.bf16.mxu0 %vm2536_vm1, %v2535_v3  ;;  %2103 = vmatpush3.bf16.msra.mxu1 %v738_v47 }
 0x166   : > { %v784_v48 = vsel %vm736_vm4, %v2850_v46, 0  ;;  %2114 = vmatprep.subr.bf16.mxu1 %v2535_v3 }
 0x167   : > { %2109 = vmatpush3.bf16.msra.mxu0 %v784_v48 }
 0x168   : > { %2120 = vmatprep.subr.bf16.mxu0 %v2535_v3 }
 0x1ce   : > { %v883_v21 = vpop.permute.xlu1 %882 }
 0x1cf   : > { %v888_v35 = vsel %vm602_vm3, %v883_v21, 0 }
 0x235   : > { %v643_v57 = vpop.f32.mrb[4].mxu1 }
 0x236   : > { %v707_v59 = vsel %vm2858_vm7, %v643_v57, -10000.0  ;;  %v2094_v60 = vpop.f32.mrb[5].mxu1 }
 0x237   : > { %v646_v61 = vpop.f32.mrb[6].mxu1  ;;  %v689_v62 = vpop.f32.mrb[8].mxu0  ;;  %v709_v63 = vsel %vm602_vm3, %v707_v59, -inf }
 0x238   : > { %v708_v0 = vsel %vm2862_vm8, %v689_v62, -10000.0  ;;  %710 = vmax.xlane.f32.xlu0 %v709_v63  ;;  %v2095_v1 = vpop.f32.mrb[7].mxu1  ;;  %v2100_v2 = vpop.f32.mrb[9].mxu0 }
 0x239   : > { %v692_v4 = vpop.f32.mrb[10].mxu0  ;;  %v712_v8 = vsel %vm602_vm3, %v708_v0, -inf }
 0x23a   : > { %v2101_v5 = vpop.f32.mrb[11].mxu0 }
 0x23c   : > { %713 = vmax.xlane.f32.xlu0 %v712_v8 }
 0x252   : > { %830 = vrot.lane.b32.xlu0 %v2822_v24, %s2537_s12 }
 0x2c5   : > { %v711_v9 = vpop.xlane.xlu0 %710 }
 0x2c6   : > { %v715_v10 = vsub.f32 %v707_v59, %v711_v9 }
 0x2c8   : > { %v717_v11 = vmul.f32 1.442695, %v715_v10 }
 0x2c9   : > { %v714_v12 = vpop.xlane.xlu0 %713 }
 0x2ca   : > { %2326 = vpow2.f32 %v717_v11  ;;  %v716_v14 = vsub.f32 %v708_v0, %v714_v12 }
 0x2cc   : > { %v719_v16 = vmul.f32 1.442695, %v716_v14 }
 0x2cd   : > { %v831_v27 = vpop.permute.xlu0 %830 }
 0x2ce   : > { %2328 = vpow2.f32 %v719_v16  ;;  %v836_v31 = vsel %vm602_vm3, %v831_v27, 0 }
 0x2d4   : > { %v2327_v17 = vpop.eup %2326 }
 0x2d5   : > { %v721_v18 = vsel %vm602_vm3, %v2327_v17, 0.0 }
 0x2d6   : > { %722 = vadd.xlane.f32.xlu1 %v721_v18 }
 0x2d8   : > { %v2329_v19 = vpop.eup %2328 }
 0x2d9   : > { %v724_v20 = vsel %vm602_vm3, %v2329_v19, 0.0 }
 0x2da   : > { %725 = vadd.xlane.f32.xlu1 %v724_v20 }
 0x2eb   : > { %827 = vrot.lane.b32.xlu1 %v2833_v34, %s2537_s12 }
 0x2ef   : > { %879 = vrot.lane.b32.xlu1 %v2836_v39, %s2537_s12 }
 0x363   : > { %v723_v22 = vpop.xlane.xlu1 %722 }
 0x364   : > { %2330 = vrcp.f32 %v723_v22 }
 0x367   : > { %v726_v23 = vpop.xlane.xlu1 %725 }
 0x368   : > { %2332 = vrcp.f32 %v726_v23 }
 0x36b   : > { %v828_v36 = vpop.permute.xlu1 %827 }
 0x36e   : > { %v2331_v25 = vpop.eup %2330 }
 0x36f   : > { %v729_v26 = vmul.f32 %v2331_v25, %v2327_v17  ;;  %v880_v37 = vpop.permute.xlu1 %879 }
 0x371   : > { %v731_v28 = vpack.c.bf16 %v729_v26, %v729_v26 }
 0x372   : > { %v2333_v30 = vpop.eup %2332 }
 0x373   : > { %v730_v32 = vmul.f32 %v2333_v30, %v2329_v19  ;;  %2105 = vmatmul.mubr.msk.bf16.vlgmr.msra.gmra.mrb[8].mxu1 %vm602_vm3, %v731_v28 }
 0x374   : > { %2115 = vmatpush3.bf16.xpose.msra.mxu1 %v836_v31  ;;  %2116 = vmatprep.mubr.msk.bf16.mxu1 %vm2536_vm1, %v2535_v3 }
 0x375   : > { %v732_v33 = vpack.c.bf16 %v730_v32, %v730_v32  ;;  %2126 = vmatprep.subr.bf16.mxu1 %v2535_v3 }
 0x377   : > { %2111 = vmatmul.mubr.msk.bf16.vlgmr.msra.gmra.mrb[12].mxu0 %vm602_vm3, %v732_v33 }
 0x378   : > { %2121 = vmatpush3.bf16.xpose.msra.mxu0 %v888_v35  ;;  %2122 = vmatprep.mubr.msk.bf16.mxu0 %vm2536_vm1, %v2535_v3 }
 0x379   : > { %2132 = vmatprep.subr.bf16.mxu0 %v2535_v3 }
 0x37b   : > { %2117 = vmatmul.mubr.msk.bf16.vlgmr.msra.gmra.mrb[12].mxu1 %vm602_vm3, %v828_v36 }
 0x37c   : > { %2128 = vmatprep.mubr.msk.bf16.mxu1 %vm2536_vm1, %v2535_v3 }
 0x37f   : > { %2123 = vmatmul.mubr.msk.bf16.vlgmr.msra.gmra.mrb[16].mxu0 %vm602_vm3, %v880_v37 }
 0x380   : > { %2134 = vmatprep.mubr.msk.bf16.mxu0 %vm2536_vm1, %v2535_v3 }
 0x446   : > { %v2896_v38 = vpop.f32.mrb[8].mxu1 }
 0x447   : > { %v2106_v40 = vpop.f32.mrb[9].mxu1 }
 0x448   : > { %v777_v41 = vpop.f32.mrb[10].mxu1 }
 0x449   : > { %v2107_v42 = vpop.f32.mrb[11].mxu1 }
 0x44a   : > { %v2898_v43 = vpop.f32.mrb[12].mxu0 }
 0x44b   : > { %v2112_v44 = vpop.f32.mrb[13].mxu0 }
 0x44c   : > { %v823_v47 = vpop.f32.mrb[14].mxu0 }
 0x44d   : > { %v2113_v48 = vpop.f32.mrb[15].mxu0 }
 0x44e   : > { %v872_v49 = vpop.f32.mrb[12].mxu1 }
 0x44f   : > { %v930_v50 = vsel %vm2858_vm7, %v872_v49, -10000.0  ;;  %v2118_v51 = vpop.f32.mrb[13].mxu1 }
 0x450   : > { %v875_v52 = vpop.f32.mrb[14].mxu1  ;;  %v932_v53 = vsel %vm602_vm3, %v930_v50, -inf }
 0x451   : > { %933 = vmax.xlane.f32.xlu0 %v932_v53  ;;  %v2119_v54 = vpop.f32.mrb[15].mxu1 }
 0x452   : > { %v924_v55 = vpop.f32.mrb[16].mxu0 }
 0x453   : > { %v931_v57 = vsel %vm2862_vm8, %v924_v55, -10000.0  ;;  %v2124_v59 = vpop.f32.mrb[17].mxu0 }
 0x454   : > { %v927_v60 = vpop.f32.mrb[18].mxu0  ;;  %v935_v61 = vsel %vm602_vm3, %v931_v57, -inf }
 0x455   : > { %936 = vmax.xlane.f32.xlu1 %v935_v61  ;;  %v2125_v62 = vpop.f32.mrb[19].mxu0 }
 0x466   : > { %1006 = vrot.lane.b32.xlu1 %v2850_v46, %s2537_s12 }
 0x46a   : > { %1056 = vrot.lane.b32.xlu1 %v2822_v24, %s2539_s18 }
 0x46e   : > { %1106 = vrot.lane.b32.xlu1 %v2824_v29, %s2539_s18 }
 0x472   : > { %1104 = vrot.lane.b32.xlu1 %v2836_v39, %s2539_s18 }
 0x4de   : > { %v934_v63 = vpop.xlane.xlu0 %933 }
 0x4df   : > { %v938_v0 = vsub.f32 %v930_v50, %v934_v63 }
 0x4e1   : > { %v940_v1 = vmul.f32 1.442695, %v938_v0 }
 0x4e2   : > { %v937_v2 = vpop.xlane.xlu1 %936 }
 0x4e3   : > { %2334 = vpow2.f32 %v940_v1  ;;  %v939_v4 = vsub.f32 %v931_v57, %v937_v2 }
 0x4e5   : > { %v942_v5 = vmul.f32 1.442695, %v939_v4 }
 0x4e6   : > { %v1007_v8 = vpop.permute.xlu1 %1006 }
 0x4e7   : > { %2336 = vpow2.f32 %v942_v5  ;;  %v1012_v9 = vsel %vm736_vm4, %v1007_v8, 0 }
 0x4e8   : > { %2133 = vmatpush3.bf16.msra.mxu0 %v1012_v9 }
 0x4e9   : > { %2144 = vmatprep.subr.bf16.mxu0 %v2535_v3 }
 0x4ea   : > { %v1057_v21 = vpop.permute.xlu1 %1056 }
 0x4eb   : > { %v1062_v28 = vsel %vm602_vm3, %v1057_v21, 0 }
 0x4ed   : > { %v2335_v10 = vpop.eup %2334 }
 0x4ee   : > { %v944_v11 = vsel %vm602_vm3, %v2335_v10, 0.0  ;;  %v1107_v27 = vpop.permute.xlu1 %1106 }
 0x4ef   : > { %945 = vadd.xlane.f32.xlu0 %v944_v11  ;;  %v1112_v31 = vsel %vm602_vm3, %v1107_v27, 0 }
 0x4f1   : > { %v2337_v12 = vpop.eup %2336 }
 0x4f2   : > { %v947_v14 = vsel %vm602_vm3, %v2337_v12, 0.0  ;;  %v1105_v33 = vpop.permute.xlu1 %1104 }
 0x4f3   : > { %948 = vadd.xlane.f32.xlu0 %v947_v14 }
 0x509   : > { %957 = vrot.lane.b32.xlu0 %v2848_v45, %s2537_s12 }
 0x50d   : > { %1054 = vrot.lane.b32.xlu0 %v2833_v34, %s2539_s18 }
 0x57c   : > { %v946_v16 = vpop.xlane.xlu0 %945 }
 0x57d   : > { %2338 = vrcp.f32 %v946_v16 }
 0x580   : > { %v949_v17 = vpop.xlane.xlu0 %948 }
 0x581   : > { %2340 = vrcp.f32 %v949_v17 }
 0x584   : > { %v958_v18 = vpop.permute.xlu0 %957 }
 0x585   : > { %v963_v19 = vsel %vm736_vm4, %v958_v18, 0 }
 0x586   : > { %2127 = vmatpush3.bf16.msra.mxu1 %v963_v19 }
 0x587   : > { %v2339_v20 = vpop.eup %2338  ;;  %2138 = vmatprep.subr.bf16.mxu1 %v2535_v3 }
 0x588   : > { %v952_v22 = vmul.f32 %v2339_v20, %v2335_v10  ;;  %v1055_v32 = vpop.permute.xlu0 %1054 }
 0x58a   : > { %v954_v23 = vpack.c.bf16 %v952_v22, %v952_v22 }
 0x58b   : > { %v2341_v25 = vpop.eup %2340 }
 0x58c   : > { %v953_v26 = vmul.f32 %v2341_v25, %v2337_v12  ;;  %2129 = vmatmul.mubr.msk.bf16.vlgmr.msra.gmra.mrb[16].mxu1 %vm602_vm3, %v954_v23 }
 0x58d   : > { %2140 = vmatprep.mubr.msk.bf16.mxu1 %vm2536_vm1, %v2535_v3 }
 0x58e   : > { %v955_v30 = vpack.c.bf16 %v953_v26, %v953_v26 }
 0x58f   : > { %2139 = vmatpush3.bf16.xpose.msra.mxu1 %v1062_v28 }
 0x590   : > { %2135 = vmatmul.mubr.msk.bf16.vlgmr.msra.gmra.mrb[20].mxu0 %vm602_vm3, %v955_v30  ;;  %2150 = vmatprep.subr.bf16.mxu1 %v2535_v3 }
 0x591   : > { %2145 = vmatpush3.bf16.xpose.msra.mxu0 %v1112_v31  ;;  %2146 = vmatprep.mubr.msk.bf16.mxu0 %vm2536_vm1, %v2535_v3 }
 0x592   : > { %2156 = vmatprep.subr.bf16.mxu0 %v2535_v3 }
 0x596   : > { %2141 = vmatmul.mubr.msk.bf16.vlgmr.msra.gmra.mrb[20].mxu1 %vm602_vm3, %v1055_v32 }
 0x597   : > { %2152 = vmatprep.mubr.msk.bf16.mxu1 %vm2536_vm1, %v2535_v3 }
 0x598   : > { %2147 = vmatmul.mubr.msk.bf16.vlgmr.msra.gmra.mrb[24].mxu0 %vm602_vm3, %v1105_v33 }
 0x599   : > { %2158 = vmatprep.mubr.msk.bf16.mxu0 %vm2536_vm1, %v2535_v3 }
 0x65f   : > { %v2940_v35 = vpop.f32.mrb[16].mxu1 }
 0x660   : > { %v2130_v36 = vpop.f32.mrb[17].mxu1 }
 0x661   : > { %v1002_v37 = vpop.f32.mrb[18].mxu1 }
 0x662   : > { %v2131_v40 = vpop.f32.mrb[19].mxu1 }
 0x663   : > { %v2942_v41 = vpop.f32.mrb[20].mxu0 }
 0x664   : > { %v2297_v42 = vpack.i.bf16 %v2942_v41, %v2940_v35  ;;  %v2136_v44 = vpop.f32.mrb[21].mxu0 }
 0x665   : > { %v1051_v47 = vpop.f32.mrb[22].mxu0 }
 0x666   : > { %v2137_v48 = vpop.f32.mrb[23].mxu0 }
 0x669   : > { %v1098_v49 = vpop.f32.mrb[20].mxu1 }
 0x66a   : > { %v1154_v50 = vsel %vm2858_vm7, %v1098_v49, -10000.0  ;;  %v2142_v51 = vpop.f32.mrb[21].mxu1 }
 0x66b   : > { %v1101_v52 = vpop.f32.mrb[22].mxu1  ;;  %v1148_v53 = vpop.f32.mrb[24].mxu0  ;;  %v1156_v54 = vsel %vm602_vm3, %v1154_v50, -inf }
 0x66c   : > { %v1155_v55 = vsel %vm2862_vm8, %v1148_v53, -10000.0  ;;  %1157 = vmax.xlane.f32.xlu0 %v1156_v54  ;;  %v2143_v57 = vpop.f32.mrb[23].mxu1  ;;  %v2148_v59 = vpop.f32.mrb[25].mxu0 }
 0x66d   : > { %v1151_v60 = vpop.f32.mrb[26].mxu0  ;;  %v1159_v61 = vsel %vm602_vm3, %v1155_v55, -inf }
 0x66e   : > { %1160 = vmax.xlane.f32.xlu1 %v1159_v61  ;;  %v2149_v62 = vpop.f32.mrb[27].mxu0 }
 0x67f   : > { %1228 = vrot.lane.b32.xlu1 %v2850_v46, %s2539_s18 }
 0x683   : > { %1278 = vrot.lane.b32.xlu1 %v2822_v24, %s2540_s27 }
 0x687   : > { %1328 = vrot.lane.b32.xlu1 %v2824_v29, %s2540_s27 }
 0x68b   : > { %1326 = vrot.lane.b32.xlu1 %v2836_v39, %s2540_s27 }
 0x6f9   : > { %v1158_v63 = vpop.xlane.xlu0 %1157 }
 0x6fa   : > { %v1162_v0 = vsub.f32 %v1154_v50, %v1158_v63 }
 0x6fb   : > { %v1161_v1 = vpop.xlane.xlu1 %1160 }
 0x6fc   : > { %v1164_v2 = vmul.f32 1.442695, %v1162_v0  ;;  %v1163_v4 = vsub.f32 %v1155_v55, %v1161_v1 }
 0x6fe   : > { %2342 = vpow2.f32 %v1164_v2  ;;  %v1166_v5 = vmul.f32 1.442695, %v1163_v4 }
 0x6ff   : > { %v1229_v8 = vpop.permute.xlu1 %1228 }
 0x700   : > { %2344 = vpow2.f32 %v1166_v5  ;;  %v1234_v9 = vsel %vm736_vm4, %v1229_v8, 0 }
 0x701   : > { %2157 = vmatpush3.bf16.msra.mxu0 %v1234_v9 }
 0x702   : > { %2168 = vmatprep.subr.bf16.mxu0 %v2535_v3 }
 0x703   : > { %v1279_v18 = vpop.permute.xlu1 %1278 }
 0x707   : > { %v1329_v23 = vpop.permute.xlu1 %1328 }
 0x708   : > { %v2343_v24 = vpop.eup %2342  ;;  %v1334_v26 = vsel %vm602_vm3, %v1329_v23, 0 }
 0x709   : > { %v1168_v29 = vsel %vm602_vm3, %v2343_v24, 0.0 }
 0x70a   : > { %v2345_v10 = vpop.eup %2344  ;;  %1169 = vadd.xlane.f32.xlu0 %v1168_v29 }
 0x70b   : > { %v1171_v39 = vsel %vm602_vm3, %v2345_v10, 0.0  ;;  %v1327_v28 = vpop.permute.xlu1 %1326 }
 0x70e   : > { %1172 = vadd.xlane.f32.xlu0 %v1171_v39 }
 0x724   : > { %1180 = vrot.lane.b32.xlu0 %v2848_v45, %s2539_s18 }
 0x728   : > { %1276 = vrot.lane.b32.xlu0 %v2833_v34, %s2540_s27  ;;  %v1284_v34 = vsel %vm602_vm3, %v1279_v18, 0 }
 0x797   : > { %v1170_v11 = vpop.xlane.xlu0 %1169 }
 0x798   : > { %2346 = vrcp.f32 %v1170_v11 }
 0x79b   : > { %v1173_v12 = vpop.xlane.xlu0 %1172 }
 0x79c   : > { %2348 = vrcp.f32 %v1173_v12 }
 0x79f   : > { %v1181_v14 = vpop.permute.xlu0 %1180 }
 0x7a0   : > { %v1186_v16 = vsel %vm736_vm4, %v1181_v14, 0  ;;  %v2318_v14 = vld [vmem:[%s2761_s8 + $0x30] sm:$0xff]  }
 0x7a1   : > { %2151 = vmatpush3.bf16.msra.mxu1 %v1186_v16  ;;  %v2319_v16 = vld [vmem:[%s2761_s8 + $0x38] sm:$0xff]   ;;  %s1832_s8 = sshll.u32 %s2544_s15, 4  ;;  %s1833_s8 = int_to_ptr.vmem [resolvable:$true] %s1832_s8 }
 0x7a2   : > { %v2347_v17 = vpop.eup %2346  ;;  %2162 = vmatprep.subr.bf16.mxu1 %v2535_v3  ;;  %s2452_s13 = scalar_lea.vmem %s1833_s8, 256  ;;  %p2459_p10 = scmp.lt.s32.totalorder %s1833_s8, %s1833_s8 }
 0x7a3   : > { %v1176_v19 = vmul.f32 %v2347_v17, %v2343_v24  ;;  %v1277_v27 = vpop.permute.xlu0 %1276  ;;  %p2453_p13 = scmp.ne.s32.totalorder %s1833_s8, %s2452_s13  ;;  %p2460_p0 = scmp.lt.s32.totalorder %s2452_s13, %s2452_s13 }
 0x7a5   : > { %v1178_v20 = vpack.c.bf16 %v1176_v19, %v1176_v19  ;;  %p2454_p12 = pnand %p2453_p13, %p2244_p11  ;;  %p2461_p5 = por %p2460_p0, %p2459_p10 }
 0x7a6   : > { %v2349_v21 = vpop.eup %2348 }
 0x7a7   : > { %v1177_v22 = vmul.f32 %v2349_v21, %v2345_v10  ;;  %2153 = vmatmul.mubr.msk.bf16.vlgmr.msra.gmra.mrb[24].mxu1 %vm602_vm3, %v1178_v20  ;;  %p2455_p8 = pneg %p2454_p12 }
 0x7a8   : > { %2164 = vmatprep.mubr.msk.bf16.mxu1 %vm2536_vm1, %v2535_v3 }
 0x7a9   : > { %v1179_v25 = vpack.c.bf16 %v1177_v22, %v1177_v22  ;;  %p2462_p9 = pnand %p2461_p5, %p2455_p8 }
 0x7aa   : > { %2163 = vmatpush3.bf16.xpose.msra.mxu1 %v1284_v34 }
 0x7ab   : > { %2159 = vmatmul.mubr.msk.bf16.vlgmr.msra.gmra.mrb[28].mxu0 %vm602_vm3, %v1179_v25  ;;  %2174 = vmatprep.subr.bf16.mxu1 %v2535_v3 }
 0x7ac   : > { %2169 = vmatpush3.bf16.xpose.msra.mxu0 %v1334_v26  ;;  %2170 = vmatprep.mubr.msk.bf16.mxu0 %vm2536_vm1, %v2535_v3 }
 0x7ad   : > { %2180 = vmatprep.subr.bf16.mxu0 %v2535_v3 }
 0x7b1   : > { %2165 = vmatmul.mubr.msk.bf16.vlgmr.msra.gmra.mrb[28].mxu1 %vm602_vm3, %v1277_v27 }
 0x7b2   : > { %2176 = vmatprep.mubr.msk.bf16.mxu1 %vm2536_vm1, %v2535_v3 }
 0x7b3   : > { %2171 = vmatmul.mubr.msk.bf16.vlgmr.msra.gmra.mrb[32].mxu0 %vm602_vm3, %v1327_v28 }
 0x7b4   : > { %2182 = vmatprep.mubr.msk.bf16.mxu0 %vm2536_vm1, %v2535_v3 }
 0x87a   : > { %v1222_v30 = vpop.f32.mrb[24].mxu1 }
 0x87b   : > { %v2154_v31 = vpop.f32.mrb[25].mxu1 }
 0x87c   : > { %v1225_v32 = vpop.f32.mrb[26].mxu1 }
 0x87d   : > { %v2155_v33 = vpop.f32.mrb[27].mxu1 }
 0x87e   : > { %v1270_v36 = vpop.f32.mrb[28].mxu0 }
 0x87f   : > { %v2302_v37 = vpack.i.bf16 %v1270_v36, %v1222_v30  ;;  %v2160_v40 = vpop.f32.mrb[29].mxu0 }
 0x880   : > { %v1273_v44 = vpop.f32.mrb[30].mxu0 }
 0x881   : > { %v2161_v47 = vpop.f32.mrb[31].mxu0 }
 0x884   : > { %v1320_v48 = vpop.f32.mrb[28].mxu1 }
 0x885   : > { %v1376_v49 = vsel %vm2858_vm7, %v1320_v48, -10000.0  ;;  %v2166_v50 = vpop.f32.mrb[29].mxu1 }
 0x886   : > { %v1323_v51 = vpop.f32.mrb[30].mxu1  ;;  %v1370_v52 = vpop.f32.mrb[32].mxu0  ;;  %v1378_v53 = vsel %vm602_vm3, %v1376_v49, -inf }
 0x887   : > { %v1377_v54 = vsel %vm2862_vm8, %v1370_v52, -10000.0  ;;  %1379 = vmax.xlane.f32.xlu0 %v1378_v53  ;;  %v2167_v55 = vpop.f32.mrb[31].mxu1  ;;  %v2172_v57 = vpop.f32.mrb[33].mxu0  ;;  %v1533_v52 = vsub.s32 3, %v2813_v13 }
 0x888   : > { %v1373_v59 = vpop.f32.mrb[34].mxu0  ;;  %v1381_v60 = vsel %vm602_vm3, %v1377_v54, -inf }
 0x889   : > { %1382 = vmax.xlane.f32.xlu1 %v1381_v60  ;;  %v2173_v61 = vpop.f32.mrb[35].mxu0  ;;  %v1534_v53 = vrot.slane %v2817_v15, %v1533_v52 }
 0x89a   : > { %1450 = vrot.lane.b32.xlu1 %v2850_v46, %s2540_s27 }
 0x89e   : > { %2298 = vrot.lane.b32.xlu1 %v2297_v42, %s2541_s30 }
 0x8a2   : > { %2303 = vrot.lane.b32.xlu1 %v2302_v37, %s2542_s9 }
 0x914   : > { %v1380_v56 = vpop.xlane.xlu0 %1379 }
 0x915   : > { %v1384_v58 = vsub.f32 %v1376_v49, %v1380_v56 }
 0x916   : > { %v1383_v62 = vpop.xlane.xlu1 %1382 }
 0x917   : > { %v1386_v63 = vmul.f32 1.442695, %v1384_v58  ;;  %v1385_v0 = vsub.f32 %v1377_v54, %v1383_v62 }
 0x919   : > { %2350 = vpow2.f32 %v1386_v63  ;;  %v1388_v1 = vmul.f32 1.442695, %v1385_v0 }
 0x91a   : > { %v1451_v2 = vpop.permute.xlu1 %1450 }
 0x91b   : > { %2352 = vpow2.f32 %v1388_v1  ;;  %v1456_v4 = vsel %vm736_vm4, %v1451_v2, 0 }
 0x91c   : > { %2181 = vmatpush3.bf16.msra.mxu0 %v1456_v4 }
 0x91d   : > { %2194 = vmatprep.subr.bf16.mxu0 %v2535_v3 }
 0x91e   : > { %v2299_v26 = vpop.permute.xlu1 %2298 }
 0x91f   : > { %v2301_v28 = vunpack.i.h.bf16 %v2299_v26  ;;  %v2300_v30 = vunpack.i.l.bf16 %v2299_v26  ;;  %v2324_v26 = vld [vmem:[%s2766_s11 + $0x10] sm:$0xff]  }
 0x921   : > { %v1523_v36 = vsel %vm602_vm3, %v2898_v43, %v2301_v28  ;;  %v1522_v37 = vsel %vm602_vm3, %v2896_v38, %v2300_v30  ;;  %v1996_v28 = vld [vmem:[%s380_s20] ss:$0 sm:$0xff] }
 0x922   : > { %v2304_v27 = vpop.permute.xlu1 %2303 }
 0x923   : > { %v2351_v46 = vpop.eup %2350  ;;  %v2306_v31 = vunpack.i.h.bf16 %v2304_v27  ;;  %v2305_v32 = vunpack.i.l.bf16 %v2304_v27  ;;  %v2325_v27 = vld [vmem:[%s2766_s11 + $0x18] sm:$0xff]  }
 0x924   : > { %v1390_v35 = vsel %vm602_vm3, %v2351_v46, 0.0 }
 0x925   : > { %v2353_v41 = vpop.eup %2352  ;;  %1391 = vadd.xlane.f32.xlu0 %v1390_v35  ;;  %v1525_v47 = vsel %vm1524_vm9, %v1522_v37, %v2305_v32  ;;  %v1526_v48 = vsel %vm1524_vm9, %v1523_v36, %v2306_v31 }
 0x926   : > { %v1393_v42 = vsel %vm602_vm3, %v2353_v41, 0.0 }
 0x929   : > { %1394 = vadd.xlane.f32.xlu0 %v1393_v42  ;;  %v2321_v42 = vld [vmem:[%s324_s14 + $0x8] sm:$0xff]  }
 0x93f   : > { %1402 = vrot.lane.b32.xlu0 %v2848_v45, %s2540_s27 }
 0x9b2   : > { %v1392_v5 = vpop.xlane.xlu0 %1391 }
 0x9b3   : > { %2354 = vrcp.f32 %v1392_v5  ;;  %v2322_v5 = vld [vmem:[%s2766_s11] sm:$0xff]  }
 0x9b6   : > { %v1395_v8 = vpop.xlane.xlu0 %1394 }
 0x9b7   : > { %2356 = vrcp.f32 %v1395_v8  ;;  %v2323_v8 = vld [vmem:[%s2766_s11 + $0x8] sm:$0xff]  }
 0x9ba   : > { %v1403_v9 = vpop.permute.xlu0 %1402 }
 0x9bb   : > { %v1408_v24 = vsel %vm736_vm4, %v1403_v9, 0 }
 0x9bc   : > { %2175 = vmatpush3.bf16.msra.mxu1 %v1408_v24 }
 0x9bd   : > { %v2355_v29 = vpop.eup %2354  ;;  %2186 = vmatprep.subr.bf16.mxu1 %v2535_v3 }
 0x9be   : > { %v1398_v10 = vmul.f32 %v2355_v29, %v2351_v46 }
 0x9c0   : > { %v1400_v39 = vpack.c.bf16 %v1398_v10, %v1398_v10 }
 0x9c1   : > { %v2357_v11 = vpop.eup %2356 }
 0x9c2   : > { %v1399_v12 = vmul.f32 %v2357_v11, %v2353_v41  ;;  %2177 = vmatmul.mubr.msk.bf16.vlgmr.msra.gmra.mrb[32].mxu1 %vm602_vm3, %v1400_v39  ;;  %v2320_v41 = vld [vmem:[%s324_s14] sm:$0xff]  }
 0x9c3   : > { %2190 = vmatprep.mubr.msk.bf16.mxu1 %vm2536_vm1, %v2535_v3  ;;  %2187 = vmatpush3.bf16.msra.mxu1 %v2318_v14 }
 0x9c4   : > { %v1401_v45 = vpack.c.bf16 %v1399_v12, %v1399_v12  ;;  %2188 = vmatprep.subr.bf16.mxu1 %v2535_v3  ;;  %v1622_v12 = vsub.s32 4, %v2813_v13 }
 0x9c6   : > { %2183 = vmatmul.mubr.msk.bf16.vlgmr.msra.gmra.mrb[36].mxu0 %vm602_vm3, %v1401_v45  ;;  %v1623_v14 = vrot.slane %v2817_v15, %v1622_v12 }
 0x9c7   : > { %2198 = vmatprep.mubr.msk.bf16.mxu0 %vm2536_vm1, %v2535_v3  ;;  %2189 = vmatpush3.bf16.msra.mxu1 %v2319_v16 }
 0x9c8   : > { %2202 = vmatprep.subr.bf16.mxu1 %v2535_v3  ;;  %2195 = vmatpush3.bf16.msra.mxu0 %v2320_v41 }
 0x9c9   : > { %2196 = vmatprep.subr.bf16.mxu0 %v2535_v3 }
 0x9cc   : > { %2197 = vmatpush3.bf16.msra.mxu0 %v2321_v42  ;;  %v1814_v42 = vsub.s32 7, %v2813_v13 }
 0xa95   : > { %v1444_v17 = vpop.f32.mrb[32].mxu1 }
 0xa96   : > { %v2178_v18 = vpop.f32.mrb[33].mxu1 }
 0xa97   : > { %v1447_v19 = vpop.f32.mrb[34].mxu1 }
 0xa98   : > { %v2179_v20 = vpop.f32.mrb[35].mxu1 }
 0xa99   : > { %v1492_v21 = vpop.f32.mrb[36].mxu0 }
 0xa9a   : > { %v2307_v22 = vpack.i.bf16 %v1492_v21, %v1444_v17  ;;  %v2184_v23 = vpop.f32.mrb[37].mxu0  ;;  %v1628_v17 = vsub.s32 5, %v2813_v13 }
 0xa9b   : > { %v1495_v34 = vpop.f32.mrb[38].mxu0 }
 0xa9c   : > { %2308 = vrot.lane.b32.xlu0 %v2307_v22, %s2543_s10  ;;  %v2185_v25 = vpop.f32.mrb[39].mxu0  ;;  %v1629_v21 = vrot.slane %v2817_v15, %v1628_v17 }
 0xb0e   : > { %v2309_v33 = vpop.permute.xlu0 %2308 }
 0xb0f   : > { %v2311_v40 = vunpack.i.h.bf16 %v2309_v33  ;;  %v2310_v44 = vunpack.i.l.bf16 %v2309_v33 }
 0xb11   : > { %v1529_v49 = vsel %vm1527_vm10, %v1526_v48, %v2311_v40  ;;  %v1528_v50 = vsel %vm1527_vm10, %v1525_v47, %v2310_v44 }
 0xb12   : > { %v1530_v51 = vpack.c.bf16 %v1529_v49, %v1528_v50 }
 0xb14   : > { %2191 = vmatmul.mubr.msk.bf16.vlgmr.msra.gmra.mrb[36].mxu1 %vm433_vm2, %v1530_v51 }
 0xb15   : > { %2210 = vmatprep.mubr.msk.bf16.mxu1 %vm2536_vm1, %v2535_v3  ;;  %2203 = vmatpush3.bf16.msra.mxu1 %v2322_v5  ;;  %v1815_v5 = vrot.slane %v2817_v15, %v1814_v42 }
 0xb16   : > { %2204 = vmatprep.subr.bf16.mxu1 %v2535_v3 }
 0xb19   : > { %2205 = vmatpush3.bf16.msra.mxu1 %v2323_v8 }
 0xb1a   : > { %2206 = vmatprep.subr.bf16.mxu1 %v2535_v3 }
 0xb1d   : > { %2207 = vmatpush3.bf16.msra.mxu1 %v2324_v26 }
 0xb1e   : > { %2208 = vmatprep.subr.bf16.mxu1 %v2535_v3  ;;  %v1713_v3 = vsub.s32 6, %v2813_v13 }
 0xb20   : > { %v1714_v48 = vrot.slane %v2817_v15, %v1713_v3 }
 0xb21   : > { %2209 = vmatpush3.bf16.msra.mxu1 %v2325_v27 }
 0xbe7   : > { %v1584_v43 = vpop.f32.mrb[36].mxu1 }
 0xbe8   : > { %v1585_v54 = vadd.f32 %v1584_v43, %v1534_v53  ;;  %v2192_v55 = vpop.f32.mrb[37].mxu1 }
 0xbe9   : > { %v1587_v38 = vpop.f32.mrb[38].mxu1 }
 0xbea   : > { %v1588_v57 = vadd.f32 %v1587_v38, %v1534_v53  ;;  %v2193_v59 = vpop.f32.mrb[39].mxu1  ;;  %v1591_v60 = vadd.f32 %v1585_v54, %v2788_v6 }
 0xbec   : > { %v1593_v61 = vsel %vm433_vm2, %v1591_v60, 0.0  ;;  %v1592_v56 = vadd.f32 %v1588_v57, %v2790_v7 }
 0xbed   : > { %1594 = vadd.xlane.f32.xlu1 %v1593_v61 }
 0xbee   : > { %v1596_v58 = vsel %vm433_vm2, %v1592_v56, 0.0 }
 0xbef   : > { %1597 = vadd.xlane.f32.xlu0 %v1596_v58 }
 0xc7a   : > { %v1595_v62 = vpop.xlane.xlu1 %1594 }
 0xc7b   : > { %v1600_v63 = vmul.f32 0.03125, %v1595_v62 }
 0xc7c   : > { %v1598_v0 = vpop.xlane.xlu0 %1597 }
 0xc7d   : > { %v1602_v1 = vsub.f32 %v1591_v60, %v1600_v63  ;;  %v1601_v2 = vmul.f32 0.03125, %v1598_v0 }
 0xc7f   : > { %v1603_v4 = vsub.f32 %v1592_v56, %v1601_v2  ;;  %v1604_v46 = vmul.f32 %v1602_v1, %v1602_v1 }
 0xc81   : > { %v1606_v6 = vsel %vm433_vm2, %v1604_v46, 0.0  ;;  %v1605_v35 = vmul.f32 %v1603_v4, %v1603_v4 }
 0xc82   : > { %1607 = vadd.xlane.f32.xlu0 %v1606_v6 }
 0xc83   : > { %v1609_v7 = vsel %vm433_vm2, %v1605_v35, 0.0 }
 0xc86   : > { %1610 = vadd.xlane.f32.xlu0 %v1609_v7 }
 0xd0f   : > { %v1608_v9 = vpop.xlane.xlu0 %1607 }
 0xd10   : > { %v1612_v24 = vmul.f32 0.03125, %v1608_v9 }
 0xd12   : > { %v1614_v29 = vadd.f32 1e-12, %v1612_v24 }
 0xd13   : > { %v1611_v10 = vpop.xlane.xlu0 %1610 }
 0xd14   : > { %2358 = vrsqrt.f32 %v1614_v29  ;;  %v1613_v39 = vmul.f32 0.03125, %v1611_v10  ;;  %v2005_v29 = vld [vmem:[%s2776_s23 + $0x8] ss:$0 sm:$0xff] }
 0xd16   : > { %v1615_v11 = vadd.f32 1e-12, %v1613_v39 }
 0xd18   : > { %2360 = vrsqrt.f32 %v1615_v11 }
 0xd1e   : > { %v2359_v45 = vpop.eup %2358 }
 0xd1f   : > { %v1618_v16 = vmul.f32 %v2359_v45, %v1602_v1 }
 0xd21   : > { %v1624_v19 = vmul.f32 %v1623_v14, %v1618_v16 }
 0xd22   : > { %v2361_v18 = vpop.eup %2360 }
 0xd23   : > { %v1619_v20 = vmul.f32 %v2361_v18, %v1603_v4  ;;  %v1630_v23 = vadd.f32 %v1629_v21, %v1624_v19 }
 0xd25   : > { %v1625_v22 = vmul.f32 %v1623_v14, %v1619_v20 }
 0xd27   : > { %v1631_v34 = vadd.f32 %v1629_v21, %v1625_v22 }
 0xd29   : > { %v1632_v25 = vpack.c.bf16 %v1631_v34, %v1630_v23 }
 0xd2b   : > { %2199 = vmatmul.mubr.msk.bf16.vlgmr.msra.gmra.mrb[40].mxu0 %vm433_vm2, %v1632_v25 }
 0xdfe   : > { %v1693_v30 = vpop.f32.mrb[40].mxu0 }
 0xdff   : > { %v1694_v31 = vadd.f32 %v1996_v28, %v1693_v30  ;;  %v2200_v32 = vpop.f32.mrb[41].mxu0 }
 0xe00   : > { %v1696_v33 = vpop.f32.mrb[42].mxu0 }
 0xe01   : > { %v1697_v36 = vadd.f32 %v1996_v28, %v1696_v33  ;;  %v2201_v37 = vpop.f32.mrb[43].mxu0  ;;  %v1700_v40 = vmax.f32 %v1694_v31, 0.0 }
 0xe03   : > { %v1701_v44 = vmax.f32 %v1697_v36, 0.0 }
 0xe05   : > { %v1702_v47 = vpack.c.bf16 %v1701_v44, %v1700_v40 }
 0xe07   : > { %2211 = vmatmul.mubr.msk.bf16.vlgmr.msra.gmra.mrb[40].mxu1 %vm1739_vm11, %v1702_v47 }
 0xeda   : > { %v1777_v49 = vpop.f32.mrb[40].mxu1 }
 0xedb   : > { %v1778_v50 = vadd.f32 %v1777_v49, %v1714_v48  ;;  %v2212_v51 = vpop.f32.mrb[41].mxu1 }
 0xedc   : > { %v1780_v52 = vpop.f32.mrb[42].mxu1 }
 0xedd   : > { %v1781_v53 = vadd.f32 %v1780_v52, %v1714_v48  ;;  %v2213_v43 = vpop.f32.mrb[43].mxu1  ;;  %v1784_v54 = vadd.f32 %v1778_v50, %v1630_v23 }
 0xedf   : > { %v1786_v55 = vsel %vm433_vm2, %v1784_v54, 0.0  ;;  %v1785_v38 = vadd.f32 %v1781_v53, %v1631_v34 }
 0xee0   : > { %1787 = vadd.xlane.f32.xlu1 %v1786_v55 }
 0xee1   : > { %v1789_v57 = vsel %vm433_vm2, %v1785_v38, 0.0 }
 0xee2   : > { %1790 = vadd.xlane.f32.xlu0 %v1789_v57 }
 0xf6d   : > { %v1788_v59 = vpop.xlane.xlu1 %1787 }
 0xf6e   : > { %v1792_v60 = vmul.f32 0.03125, %v1788_v59 }
 0xf6f   : > { %v1791_v61 = vpop.xlane.xlu0 %1790 }
 0xf70   : > { %v1794_v56 = vsub.f32 %v1784_v54, %v1792_v60  ;;  %v1793_v58 = vmul.f32 0.03125, %v1791_v61 }
 0xf72   : > { %v1795_v62 = vsub.f32 %v1785_v38, %v1793_v58  ;;  %v1796_v63 = vmul.f32 %v1794_v56, %v1794_v56 }
 0xf74   : > { %v1798_v0 = vsel %vm433_vm2, %v1796_v63, 0.0  ;;  %v1797_v1 = vmul.f32 %v1795_v62, %v1795_v62 }
 0xf75   : > { %1799 = vadd.xlane.f32.xlu1 %v1798_v0 }
 0xf76   : > { %v1801_v2 = vsel %vm433_vm2, %v1797_v1, 0.0 }
 0xf77   : > { %1802 = vadd.xlane.f32.xlu0 %v1801_v2 }
0x1002   : > { %v1800_v4 = vpop.xlane.xlu1 %1799 }
0x1003   : > { %v1804_v46 = vmul.f32 0.03125, %v1800_v4 }
0x1004   : > { %v1803_v6 = vpop.xlane.xlu0 %1802 }
0x1005   : > { %v1806_v35 = vadd.f32 1e-12, %v1804_v46  ;;  %v1805_v7 = vmul.f32 0.03125, %v1803_v6 }
0x1007   : > { %2362 = vrsqrt.f32 %v1806_v35  ;;  %v1807_v41 = vadd.f32 1e-12, %v1805_v7 }
0x1009   : > { %2364 = vrsqrt.f32 %v1807_v41 }
0x1011   : > { %v2363_v8 = vpop.eup %2362 }
0x1012   : > { %v1810_v9 = vmul.f32 %v2363_v8, %v1794_v56 }
0x1013   : > { %v2365_v24 = vpop.eup %2364 }
0x1014   : > { %v1816_v10 = vmul.f32 %v1815_v5, %v1810_v9  ;;  %v1811_v39 = vmul.f32 %v2365_v24, %v1795_v62 }
0x1016   : > { %v1817_v11 = vmul.f32 %v1815_v5, %v1811_v39  ;;  %v1822_v12 = vadd.f32 %v2005_v29, %v1816_v10 }
0x1018   : > { %v1823_v45 = vadd.f32 %v2005_v29, %v1817_v11  ;;  %1824 = vst.msk [vmem:[#allocation8] sm:$0xff] %vm433_vm2, %v1822_v12 }
0x101a   : > { %1825 = vst.msk [vmem:[#allocation8 + $0x8] sm:$0xff] %vm433_vm2, %v1823_v45 }
0x101b   : > { %2465 = shalt.err (!%p2462_p9)
}
0x101c   : > { %s2466_s19 = scalar_lea.hbm %s3108_s7, 256 }
0x101d   : > { %p2467_p1 = scmp.ne.s32.totalorder %s3108_s7, %s2466_s19  ;;  %p2472_p2 = scmp.lt.u32.totalorder %s2466_s19, %s3108_s7 }
0x101f   : > { %p2468_p3 = pnand %p2467_p1, %p2244_p11 }
0x1021   : > { %p2469_p6 = pneg %p2468_p3 }
0x1023   : > { %p2474_p4 = pnand %p2472_p2, %p2469_p6 }
0x1025   : > { %2477 = shalt.err (!%p2474_p4)
}
0x1026   : > { %s2545_s23 = smov 128  }
0x1027   : > { %2225 = dma.vmem_to_hbm [thread:$0]  (%p2244_p11), %s1833_s8, 256, %s3108_s7, [#allocation4], %s2545_s23, %s2545_s23, %s2541_s30  }
0x1028   : > { %2507 = dma.done.wait (%p2244_p11), [#allocation4], 256  }
0x1029   : > { %2509 = vsyncadd (%p2244_p11), [#allocation4], 4294967040 }
0x102a PF: > { %s3131_s27 = sld [smem:[#allocation13_spill]]  ;;  %p17_p7 = scmp.ge.s32.totalorder %s2608_s29, 4  }
0x102b   : > { %s3132_s24 = smov %s2516_s25  ;;  %s3133_s25 = smov %s2520_s26 }
0x102c   :  { %19 = sbr.rel (!%p17_p7) target bundleno = 4 (0x4), region = 108 }
0x1030   : > { %s3134_s26 = smov %s3131_s27  ;;  %s3135_s27 = smov %s2608_s29 }
0x1033   :  { %1848 = vsyncpa [#allocation3], 1 }
0x1034   :  { %1850 = vsyncpa [#allocation3 + $0x1], 1 }
0x1035   :  { %1851 = vsyncpa [#allocation6], 1 }
0x1036   :  { %1852 = vsyncpa [#allocation4], 1 }
0x1037   :  { %1854 = vsyncpa [#allocation4 + $0x1], 1 }

</bundles_post_ra>
